<compile_context>
chip_gen: v7x
topology: tpu7x:2x2x1
jax: 0.10.0
libtpu: 0.0.40
codegen_flags: <defaults>
</compile_context>

<pallas_src>
import functools

import jax
import jax.numpy as jnp
from jax.experimental import pallas as pl
from jax.experimental.pallas import tpu as pltpu


# --------------------------------------------------------------------------
# Fused projection + attention + message-aggregation kernel
# --------------------------------------------------------------------------
def _gat_kernel(reg_ref, tgt_ref, adj_ref, w_reg_ref, w_reg_bc_ref,
                w_tgt_big_ref, rep_h_ref, expand_f_ref, tile_m_ref, out_ref,
                *, bb, n_reg, n_tgt, n_heads, out_features, alpha):
    H, F = n_heads, out_features
    NTH = n_tgt * H            # attention lane width: (target m, head h)
    NTHF = NTH * F             # message lane width:   (m, h, f)
    d_reg = reg_ref.shape[-1]

    # ---- projections (MXU; batch folded into the M dimension) ---------------
    x_reg = reg_ref[...].reshape(bb * n_reg, d_reg)                   # [bb*Nr, Dr]
    h_reg = jnp.dot(x_reg, w_reg_ref[...],
                    preferred_element_type=jnp.float32)               # [bb*Nr, H*F]
    # e_reg already broadcast over targets: column (m*H + h) -> e_reg[b, n, h]
    e_reg = jnp.dot(x_reg, w_reg_bc_ref[...],
                    preferred_element_type=jnp.float32)               # [bb*Nr, NTH]
    # e_tgt directly in the (m, h) lane layout via a block-diagonal weight.
    e_tgt = jnp.dot(tgt_ref[...], w_tgt_big_ref[...],
                    preferred_element_type=jnp.float32)               # [bb, NTH]

    # ---- attention logits / softmax over regulators --------------------------
    scores = e_reg.reshape(bb, n_reg, NTH) + e_tgt[:, None, :]        # [bb, Nr, NTH]
    scores = jnp.where(scores > 0, scores, alpha * scores)            # LeakyReLU

    # Adjacency mask expanded to the (m, h) lane layout with an exact 0/1 matmul.
    edge = (adj_ref[...] != 0.0).astype(jnp.float32)
    edge = jnp.dot(edge.reshape(bb * n_reg, n_tgt), rep_h_ref[...],
                   preferred_element_type=jnp.float32)
    masked = edge.reshape(bb, n_reg, NTH) < 0.5

    # Finite mask: no -inf -> no NaN; fully-masked columns end up with zeros.
    scores = jnp.where(masked, -1e30, scores)
    m = jnp.max(scores, axis=1, keepdims=True)
    p = jnp.where(masked, 0.0, jnp.exp(scores - m))
    denom = jnp.sum(p, axis=1, keepdims=True)
    denom = jnp.where(denom == 0.0, 1.0, denom)
    inv = pl.reciprocal(denom, approx=True)        # EUP slot, not a VPU divide
    inv = inv * (2.0 - denom * inv)                # one Newton step -> f32 accuracy
    attn = p * inv                                 # [bb, Nr, NTH]

    # ---- messages: two large expansion matmuls + elementwise + batch sum -----
    a_exp = jnp.dot(attn.reshape(bb * n_reg, NTH), expand_f_ref[...],
                    preferred_element_type=jnp.float32)               # [bb*Nr, NTHF]
    h_til = jnp.dot(h_reg, tile_m_ref[...],
                    preferred_element_type=jnp.float32)               # [bb*Nr, NTHF]
    msgs = jnp.sum((a_exp * h_til).reshape(bb, n_reg, NTHF), axis=0)  # [Nr, NTHF]

    # Single resident-accumulator update per grid step (lane-dense, 1024 lanes).
    @pl.when(pl.program_id(0) == 0)
    def _():
        out_ref[...] = msgs

    @pl.when(pl.program_id(0) > 0)
    def _():
        out_ref[...] += msgs


def message_passing_gat(reg, tgt, adj, w_reg, w_tgt, att, *,
                        n_heads, out_features, alpha=0.2):
    B, N_reg, D_reg = reg.shape
    _, N_tgt, D_tgt = tgt.shape
    H, F = n_heads, out_features
    HF = H * F
    NTH = N_tgt * H
    NTHF = NTH * F
    f32 = jnp.float32

    # ---- parameter / constant layout plumbing (plain JAX, done once) --------
    eye_h = jnp.eye(H, dtype=f32)
    # Block-diagonal att:  (h2d @ a_blk)[:, h] = sum_f h2d[:, h*F+f] * att[h, f]
    a_blk_reg = (att[:, :F, None] * eye_h[:, None, :]).reshape(HF, H)
    a_blk_tgt = (att[:, F:, None] * eye_h[:, None, :]).reshape(HF, H)
    w_reg_eff = w_reg @ a_blk_reg                                   # [D_reg, H]
    w_tgt_eff = w_tgt @ a_blk_tgt                                   # [D_tgt, H]
    # e_reg weight pre-broadcast over targets: col (m*H + h) -> w_reg_eff[:, h]
    w_reg_bc = jnp.tile(w_reg_eff, (1, N_tgt))                      # [D_reg, NTH]
    # e_tgt weight block-diagonal over targets (consumes tgt flattened per batch)
    w_tgt_big = jnp.kron(jnp.eye(N_tgt, dtype=f32), w_tgt_eff)      # [Nt*D_tgt, NTH]
    # 0/1 expansion matrices (MXU-friendly lane expansions inside the kernel)
    rep_h = jnp.repeat(jnp.eye(N_tgt, dtype=f32), H, axis=1)        # [Nt, NTH]
    expand_f = jnp.repeat(jnp.eye(NTH, dtype=f32), F, axis=1)       # [NTH, NTHF]
    tile_m = jnp.tile(jnp.eye(HF, dtype=f32), (1, N_tgt))           # [HF, NTHF]

    tgt_flat = tgt.reshape(B, N_tgt * D_tgt)

    # Batch block size per grid step (batch axis is a reduction -> "arbitrary").
    bb = B if B <= 8 else next(d for d in (8, 4, 2, 1) if B % d == 0)

    kernel = functools.partial(_gat_kernel, bb=bb, n_reg=N_reg, n_tgt=N_tgt,
                               n_heads=H, out_features=F, alpha=alpha)

    out = pl.pallas_call(
        kernel,
        out_shape=jax.ShapeDtypeStruct((N_reg, NTHF), f32),
        grid_spec=pltpu.PrefetchScalarGridSpec(
            num_scalar_prefetch=0,
            grid=(B // bb,),
            in_specs=[
                pl.BlockSpec((bb, N_reg, D_reg), lambda b: (b, 0, 0)),   # reg
                pl.BlockSpec((bb, N_tgt * D_tgt), lambda b: (b, 0)),     # tgt (flat)
                pl.BlockSpec((bb, N_reg, N_tgt), lambda b: (b, 0, 0)),   # adjacency
                pl.BlockSpec((D_reg, HF), lambda b: (0, 0)),             # W_reg
                pl.BlockSpec((D_reg, NTH), lambda b: (0, 0)),            # w_reg_bc
                pl.BlockSpec((N_tgt * D_tgt, NTH), lambda b: (0, 0)),    # w_tgt_big
                pl.BlockSpec((N_tgt, NTH), lambda b: (0, 0)),            # rep_h
                pl.BlockSpec((NTH, NTHF), lambda b: (0, 0)),             # expand_f
                pl.BlockSpec((HF, NTHF), lambda b: (0, 0)),              # tile_m
            ],
            out_specs=pl.BlockSpec((N_reg, NTHF), lambda b: (0, 0)),     # resident acc
        ),
        compiler_params=pltpu.CompilerParams(
            dimension_semantics=("arbitrary",)),     # batch axis is a reduction
    )(reg, tgt_flat, adj, w_reg, w_reg_bc, w_tgt_big, rep_h, expand_f, tile_m)

    # Output lanes are already ordered (target m, head h, feature f) == 'nmhf'.
    msgs = out.reshape(N_reg, N_tgt, HF)
    # Same (shape-fragile) reshape as the PyTorch module.
    assert N_reg == B, "module's final reshape requires num_regulators == batch_size"
    return msgs.reshape(B, N_tgt, HF)


# --------------------------------------------------------------------------
# Pure-JAX mirror of the PyTorch forward (eval mode) for validation.
# --------------------------------------------------------------------------
def _ref_forward(reg, tgt, adj, w_reg, w_tgt, att, *, n_heads, out_features, alpha=0.2):
    B, N_reg, _ = reg.shape
    N_tgt = tgt.shape[1]
    H, F = n_heads, out_features
    h_reg = (reg @ w_reg).reshape(B, N_reg, H, F)
    h_tgt = (tgt @ w_tgt).reshape(B, N_tgt, H, F)
    pair = jnp.concatenate(
        [jnp.broadcast_to(h_reg[:, :, None], (B, N_reg, N_tgt, H, F)),
         jnp.broadcast_to(h_tgt[:, None], (B, N_reg, N_tgt, H, F))], axis=-1)
    e = jnp.einsum('bnmhf,hf->bnmh', pair, att)
    e = jnp.where(e > 0, e, alpha * e)
    e = jnp.where(adj[..., None] == 0, -jnp.inf, e)
    a = jax.nn.softmax(e, axis=1)
    msgs = jnp.einsum('bnmh,bnhf->nmhf', a, h_reg)
    return msgs.reshape(B, N_tgt, H * F)


def _xavier_uniform(key, shape, fan_in, fan_out):
    bound = (6.0 / (fan_in + fan_out)) ** 0.5
    return jax.random.uniform(key, shape, jnp.float32, -bound, bound)


if __name__ == "__main__":
    # Small shapes. NOTE: the module's final reshape requires N_reg == B.
    B = 8
    N_reg = 8
    N_tgt = 16
    regulator_dim = 32
    target_dim = 32
    out_features = 16
    n_heads = 4
    alpha = 0.2
    HF = out_features * n_heads

    key = jax.random.PRNGKey(0)
    k_reg, k_tgt, k_adj, k_wr, k_wt, k_att = jax.random.split(key, 6)

    reg = jax.random.normal(k_reg, (B, N_reg, regulator_dim), jnp.float32)
    tgt = jax.random.normal(k_tgt, (B, N_tgt, target_dim), jnp.float32)
    adj = (jax.random.uniform(k_adj, (B, N_reg, N_tgt)) < 0.5).astype(jnp.float32)
    adj = adj.at[:, 0, :].set(1.0)  # every target has >=1 regulator (ref softmax needs it)

    # Deterministic xavier_uniform-style parameter init (shapes from __init__).
    w_reg = _xavier_uniform(k_wr, (regulator_dim, HF), regulator_dim, HF)
    w_tgt = _xavier_uniform(k_wt, (target_dim, HF), target_dim, HF)
    # torch att param has shape (1, n_heads, 2*out_features); use the squeezed (H, 2F).
    att = _xavier_uniform(k_att, (n_heads, 2 * out_features),
                          n_heads * 2 * out_features, 2 * out_features)

    out = message_passing_gat(reg, tgt, adj, w_reg, w_tgt, att,
                              n_heads=n_heads, out_features=out_features, alpha=alpha)
    out = jax.block_until_ready(out)

    ref = _ref_forward(reg, tgt, adj, w_reg, w_tgt, att,
                       n_heads=n_heads, out_features=out_features, alpha=alpha)
    assert out.shape == (B, N_tgt, HF), out.shape
    assert jnp.allclose(out, ref, rtol=1e-5, atol=2e-4), float(jnp.max(jnp.abs(out - ref)))

    print("KERNEL_OK")
</pallas_src>

<mosaic_0001>
module attributes {stable_mosaic.version = 11 : i64} {
  func.func @_gat_kernel(%arg0: i32, %arg1: memref<8x8x32xf32, #tpu.memory_space<vmem>>, %arg2: memref<8x512xf32, #tpu.memory_space<vmem>>, %arg3: memref<8x8x16xf32, #tpu.memory_space<vmem>>, %arg4: memref<32x64xf32, #tpu.memory_space<vmem>>, %arg5: memref<32x64xf32, #tpu.memory_space<vmem>>, %arg6: memref<512x64xf32, #tpu.memory_space<vmem>>, %arg7: memref<16x64xf32, #tpu.memory_space<vmem>>, %arg8: memref<64x1024xf32, #tpu.memory_space<vmem>>, %arg9: memref<64x1024xf32, #tpu.memory_space<vmem>>, %arg10: memref<8x1024xf32, #tpu.memory_space<vmem>>) attributes {dimension_semantics = [#tpu.dimension_semantics<arbitrary>], iteration_bounds = array<i64: 1>, scalar_prefetch = 0 : i64, scratch_operands = 0 : i64, tpu.core_type = #tpu.core_type<tc>, window_params = [{transform_indices = @transform_0, window_bounds = array<i64: 8, 8, 32>}, {transform_indices = @transform_1, window_bounds = array<i64: 8, 512>}, {transform_indices = @transform_2, window_bounds = array<i64: 8, 8, 16>}, {pipeline_mode = #tpu.pipeline_mode<synchronous>, transform_indices = @transform_3, window_bounds = array<i64: 32, 64>}, {pipeline_mode = #tpu.pipeline_mode<synchronous>, transform_indices = @transform_4, window_bounds = array<i64: 32, 64>}, {pipeline_mode = #tpu.pipeline_mode<synchronous>, transform_indices = @transform_5, window_bounds = array<i64: 512, 64>}, {pipeline_mode = #tpu.pipeline_mode<synchronous>, transform_indices = @transform_6, window_bounds = array<i64: 16, 64>}, {pipeline_mode = #tpu.pipeline_mode<synchronous>, transform_indices = @transform_7, window_bounds = array<i64: 64, 1024>}, {pipeline_mode = #tpu.pipeline_mode<synchronous>, transform_indices = @transform_8, window_bounds = array<i64: 64, 1024>}, {pipeline_mode = #tpu.pipeline_mode<synchronous>, transform_indices = @transform_9, window_bounds = array<i64: 8, 1024>}]} {
    %c0 = arith.constant 0 : index
    %c0_0 = arith.constant 0 : index
    %c0_1 = arith.constant 0 : index
    %0 = vector.load %arg1[%c0, %c0_0, %c0_1] : memref<8x8x32xf32, #tpu.memory_space<vmem>>, vector<8x8x32xf32>
    %1 = vector.shape_cast %0 : vector<8x8x32xf32> to vector<64x32xf32>
    %c0_2 = arith.constant 0 : index
    %c0_3 = arith.constant 0 : index
    %2 = vector.load %arg4[%c0_2, %c0_3] : memref<32x64xf32, #tpu.memory_space<vmem>>, vector<32x64xf32>
    %cst = arith.constant dense<0.000000e+00> : vector<64x64xf32>
    %3 = tpu.matmul %1, %2, %cst {dimension_numbers = #tpu.dot_dimension_numbers<[1], [0], [0], [1], [0, 0, 1, 1], [], []>} : vector<64x32xf32>, vector<32x64xf32>, vector<64x64xf32> -> vector<64x64xf32>
    %c0_4 = arith.constant 0 : index
    %c0_5 = arith.constant 0 : index
    %4 = vector.load %arg5[%c0_4, %c0_5] : memref<32x64xf32, #tpu.memory_space<vmem>>, vector<32x64xf32>
    %cst_6 = arith.constant dense<0.000000e+00> : vector<64x64xf32>
    %5 = tpu.matmul %1, %4, %cst_6 {dimension_numbers = #tpu.dot_dimension_numbers<[1], [0], [0], [1], [0, 0, 1, 1], [], []>} : vector<64x32xf32>, vector<32x64xf32>, vector<64x64xf32> -> vector<64x64xf32>
    %c0_7 = arith.constant 0 : index
    %c0_8 = arith.constant 0 : index
    %6 = vector.load %arg2[%c0_7, %c0_8] : memref<8x512xf32, #tpu.memory_space<vmem>>, vector<8x512xf32>
    %c0_9 = arith.constant 0 : index
    %c0_10 = arith.constant 0 : index
    %7 = vector.load %arg6[%c0_9, %c0_10] : memref<512x64xf32, #tpu.memory_space<vmem>>, vector<512x64xf32>
    %cst_11 = arith.constant dense<0.000000e+00> : vector<8x64xf32>
    %8 = tpu.matmul %6, %7, %cst_11 {dimension_numbers = #tpu.dot_dimension_numbers<[1], [0], [0], [1], [0, 0, 1, 1], [], []>} : vector<8x512xf32>, vector<512x64xf32>, vector<8x64xf32> -> vector<8x64xf32>
    %9 = vector.shape_cast %5 : vector<64x64xf32> to vector<8x8x64xf32>
    %10 = vector.shape_cast %8 : vector<8x64xf32> to vector<8x1x64xf32>
    %11 = vector.broadcast %10 : vector<8x1x64xf32> to vector<8x8x64xf32>
    %12 = arith.addf %9, %11 : vector<8x8x64xf32>
    %cst_12 = arith.constant 0.000000e+00 : f32
    %13 = vector.broadcast %cst_12 : f32 to vector<8x8x64xf32>
    %14 = arith.cmpf ogt, %12, %13 : vector<8x8x64xf32>
    %cst_13 = arith.constant 2.000000e-01 : f32
    %15 = vector.broadcast %cst_13 : f32 to vector<8x8x64xf32>
    %16 = arith.mulf %15, %12 : vector<8x8x64xf32>
    %17 = arith.select %14, %12, %16 : vector<8x8x64xi1>, vector<8x8x64xf32>
    %c0_14 = arith.constant 0 : index
    %c0_15 = arith.constant 0 : index
    %c0_16 = arith.constant 0 : index
    %18 = vector.load %arg3[%c0_14, %c0_15, %c0_16] : memref<8x8x16xf32, #tpu.memory_space<vmem>>, vector<8x8x16xf32>
    %cst_17 = arith.constant 0.000000e+00 : f32
    %19 = vector.broadcast %cst_17 : f32 to vector<8x8x16xf32>
    %20 = arith.cmpf one, %18, %19 : vector<8x8x16xf32>
    %21 = arith.extui %20 : vector<8x8x16xi1> to vector<8x8x16xi32>
    %22 = arith.sitofp %21 : vector<8x8x16xi32> to vector<8x8x16xf32>
    %23 = vector.shape_cast %22 : vector<8x8x16xf32> to vector<64x16xf32>
    %c0_18 = arith.constant 0 : index
    %c0_19 = arith.constant 0 : index
    %24 = vector.load %arg7[%c0_18, %c0_19] : memref<16x64xf32, #tpu.memory_space<vmem>>, vector<16x64xf32>
    %cst_20 = arith.constant dense<0.000000e+00> : vector<64x64xf32>
    %25 = tpu.matmul %23, %24, %cst_20 {dimension_numbers = #tpu.dot_dimension_numbers<[1], [0], [0], [1], [0, 0, 1, 1], [], []>} : vector<64x16xf32>, vector<16x64xf32>, vector<64x64xf32> -> vector<64x64xf32>
    %26 = vector.shape_cast %25 : vector<64x64xf32> to vector<8x8x64xf32>
    %cst_21 = arith.constant 5.000000e-01 : f32
    %27 = vector.broadcast %cst_21 : f32 to vector<8x8x64xf32>
    %28 = arith.cmpf olt, %26, %27 : vector<8x8x64xf32>
    %cst_22 = arith.constant -1.000000e+30 : f32
    %29 = vector.broadcast %cst_22 : f32 to vector<8x8x64xf32>
    %30 = arith.select %28, %29, %17 : vector<8x8x64xi1>, vector<8x8x64xf32>
    %cst_23 = arith.constant dense<0xFF800000> : vector<8x64xf32>
    %31 = vector.multi_reduction <maximumf>, %30, %cst_23 [1] : vector<8x8x64xf32> to vector<8x64xf32>
    %32 = vector.shape_cast %31 : vector<8x64xf32> to vector<8x1x64xf32>
    %33 = vector.broadcast %32 : vector<8x1x64xf32> to vector<8x8x64xf32>
    %34 = arith.subf %30, %33 : vector<8x8x64xf32>
    %35 = math.exp %34 : vector<8x8x64xf32>
    %cst_24 = arith.constant 0.000000e+00 : f32
    %36 = vector.broadcast %cst_24 : f32 to vector<8x8x64xf32>
    %37 = arith.select %28, %36, %35 : vector<8x8x64xi1>, vector<8x8x64xf32>
    %cst_25 = arith.constant dense<0.000000e+00> : vector<8x64xf32>
    %38 = vector.multi_reduction <add>, %37, %cst_25 [1] : vector<8x8x64xf32> to vector<8x64xf32>
    %39 = vector.shape_cast %38 : vector<8x64xf32> to vector<8x1x64xf32>
    %cst_26 = arith.constant 0.000000e+00 : f32
    %40 = vector.broadcast %cst_26 : f32 to vector<8x1x64xf32>
    %41 = arith.cmpf oeq, %39, %40 : vector<8x1x64xf32>
    %cst_27 = arith.constant 1.000000e+00 : f32
    %42 = vector.broadcast %cst_27 : f32 to vector<8x1x64xf32>
    %43 = arith.select %41, %42, %39 : vector<8x1x64xi1>, vector<8x1x64xf32>
    %44 = tpu.reciprocal %43 {approx = true} : vector<8x1x64xf32> -> vector<8x1x64xf32>
    %45 = arith.mulf %43, %44 : vector<8x1x64xf32>
    %cst_28 = arith.constant 2.000000e+00 : f32
    %46 = vector.broadcast %cst_28 : f32 to vector<8x1x64xf32>
    %47 = arith.subf %46, %45 : vector<8x1x64xf32>
    %48 = arith.mulf %44, %47 : vector<8x1x64xf32>
    %49 = vector.broadcast %48 : vector<8x1x64xf32> to vector<8x8x64xf32>
    %50 = arith.mulf %37, %49 : vector<8x8x64xf32>
    %51 = vector.shape_cast %50 : vector<8x8x64xf32> to vector<64x64xf32>
    %c0_29 = arith.constant 0 : index
    %c0_30 = arith.constant 0 : index
    %52 = vector.load %arg8[%c0_29, %c0_30] : memref<64x1024xf32, #tpu.memory_space<vmem>>, vector<64x1024xf32>
    %cst_31 = arith.constant dense<0.000000e+00> : vector<64x1024xf32>
    %53 = tpu.matmul %51, %52, %cst_31 {dimension_numbers = #tpu.dot_dimension_numbers<[1], [0], [0], [1], [0, 0, 1, 1], [], []>} : vector<64x64xf32>, vector<64x1024xf32>, vector<64x1024xf32> -> vector<64x1024xf32>
    %c0_32 = arith.constant 0 : index
    %c0_33 = arith.constant 0 : index
    %54 = vector.load %arg9[%c0_32, %c0_33] : memref<64x1024xf32, #tpu.memory_space<vmem>>, vector<64x1024xf32>
    %cst_34 = arith.constant dense<0.000000e+00> : vector<64x1024xf32>
    %55 = tpu.matmul %3, %54, %cst_34 {dimension_numbers = #tpu.dot_dimension_numbers<[1], [0], [0], [1], [0, 0, 1, 1], [], []>} : vector<64x64xf32>, vector<64x1024xf32>, vector<64x1024xf32> -> vector<64x1024xf32>
    %56 = arith.mulf %53, %55 : vector<64x1024xf32>
    %57 = vector.shape_cast %56 : vector<64x1024xf32> to vector<8x8x1024xf32>
    %cst_35 = arith.constant dense<0.000000e+00> : vector<8x1024xf32>
    %58 = vector.multi_reduction <add>, %57, %cst_35 [0] : vector<8x8x1024xf32> to vector<8x1024xf32>
    %c0_i32 = arith.constant 0 : i32
    %59 = arith.cmpi eq, %arg0, %c0_i32 : i32
    %60 = arith.extui %59 : i1 to i32
    %c0_i32_36 = arith.constant 0 : i32
    %61 = arith.cmpi ne, %60, %c0_i32_36 : i32
    scf.if %61 {
      %c0_39 = arith.constant 0 : index
      %c0_40 = arith.constant 0 : index
      %65 = vector.load %arg10[%c0_39, %c0_40] : memref<8x1024xf32, #tpu.memory_space<vmem>>, vector<8x1024xf32>
      tpu.vector_store %arg10[%c0_39, %c0_40], %58 {strides = array<i32>} : memref<8x1024xf32, #tpu.memory_space<vmem>>, vector<8x1024xf32>,
    } else {
    }
    %c0_i32_37 = arith.constant 0 : i32
    %62 = arith.cmpi sgt, %arg0, %c0_i32_37 : i32
    %63 = arith.extui %62 : i1 to i32
    %c0_i32_38 = arith.constant 0 : i32
    %64 = arith.cmpi ne, %63, %c0_i32_38 : i32
    scf.if %64 {
      %c0_39 = arith.constant 0 : index
      %c0_40 = arith.constant 0 : index
      %65 = vector.load %arg10[%c0_39, %c0_40] : memref<8x1024xf32, #tpu.memory_space<vmem>>, vector<8x1024xf32>
      %66 = arith.addf %65, %58 : vector<8x1024xf32>
      %c0_41 = arith.constant 0 : index
      %c0_42 = arith.constant 0 : index
      %67 = vector.load %arg10[%c0_41, %c0_42] : memref<8x1024xf32, #tpu.memory_space<vmem>>, vector<8x1024xf32>
      tpu.vector_store %arg10[%c0_41, %c0_42], %66 {strides = array<i32>} : memref<8x1024xf32, #tpu.memory_space<vmem>>, vector<8x1024xf32>,
    } else {
    }
    return
  }
  func.func @transform_0(%arg0: i32) -> (i32, i32, i32) {
    %c0_i32 = arith.constant 0 : i32
    %c0_i32_0 = arith.constant 0 : i32
    %c0_i32_1 = arith.constant 0 : i32
    return %arg0, %c0_i32, %c0_i32_0 : i32, i32, i32
  }
  func.func @transform_1(%arg0: i32) -> (i32, i32) {
    %c0_i32 = arith.constant 0 : i32
    %c0_i32_0 = arith.constant 0 : i32
    return %arg0, %c0_i32 : i32, i32
  }
  func.func @transform_2(%arg0: i32) -> (i32, i32, i32) {
    %c0_i32 = arith.constant 0 : i32
    %c0_i32_0 = arith.constant 0 : i32
    %c0_i32_1 = arith.constant 0 : i32
    return %arg0, %c0_i32, %c0_i32_0 : i32, i32, i32
  }
  func.func @transform_3(%arg0: i32) -> (i32, i32) {
    %c0_i32 = arith.constant 0 : i32
    %c0_i32_0 = arith.constant 0 : i32
    %c0_i32_1 = arith.constant 0 : i32
    return %c0_i32, %c0_i32_0 : i32, i32
  }
  func.func @transform_4(%arg0: i32) -> (i32, i32) {
    %c0_i32 = arith.constant 0 : i32
    %c0_i32_0 = arith.constant 0 : i32
    %c0_i32_1 = arith.constant 0 : i32
    return %c0_i32, %c0_i32_0 : i32, i32
  }
  func.func @transform_5(%arg0: i32) -> (i32, i32) {
    %c0_i32 = arith.constant 0 : i32
    %c0_i32_0 = arith.constant 0 : i32
    %c0_i32_1 = arith.constant 0 : i32
    return %c0_i32, %c0_i32_0 : i32, i32
  }
  func.func @transform_6(%arg0: i32) -> (i32, i32) {
    %c0_i32 = arith.constant 0 : i32
    %c0_i32_0 = arith.constant 0 : i32
    %c0_i32_1 = arith.constant 0 : i32
    return %c0_i32, %c0_i32_0 : i32, i32
  }
  func.func @transform_7(%arg0: i32) -> (i32, i32) {
    %c0_i32 = arith.constant 0 : i32
    %c0_i32_0 = arith.constant 0 : i32
    %c0_i32_1 = arith.constant 0 : i32
    return %c0_i32, %c0_i32_0 : i32, i32
  }
  func.func @transform_8(%arg0: i32) -> (i32, i32) {
    %c0_i32 = arith.constant 0 : i32
    %c0_i32_0 = arith.constant 0 : i32
    %c0_i32_1 = arith.constant 0 : i32
    return %c0_i32, %c0_i32_0 : i32, i32
  }
  func.func @transform_9(%arg0: i32) -> (i32, i32) {
    %c0_i32 = arith.constant 0 : i32
    %c0_i32_0 = arith.constant 0 : i32
    %c0_i32_1 = arith.constant 0 : i32
    return %c0_i32, %c0_i32_0 : i32, i32
  }
}

</mosaic_0001>

<bundles_post_ra>
// kernel: tpu_custom_call.1
= control target key start
LH: loop header
LB: loop body
LE: loop exit
PB: predicated region body
PF: predicated region fallthrough
CT: control target
= control target key end

     0   :  { %14 = vsyncpa [#allocation3], 0  ;;  %s4009_s0 = inlined_call_operand.vmem [shape: f32[8,8,32], index: 0, kind: input, shape index: {}]   ;;  %s4010_s1 = inlined_call_operand.vmem [shape: f32[8,512], index: 1, kind: input, shape index: {}]   ;;  %s4011_s2 = inlined_call_operand.vmem [shape: f32[8,8,16], index: 2, kind: input, shape index: {}]   ;;  %s4012_s3 = inlined_call_operand.vmem [shape: f32[32,64], index: 3, kind: input, shape index: {}]   ;;  %s4013_s4 = inlined_call_operand.vmem [shape: f32[32,64], index: 4, kind: input, shape index: {}]   ;;  %s4014_s5 = inlined_call_operand.vmem [shape: f32[512,64], index: 5, kind: input, shape index: {}]   ;;  %s4015_s6 = inlined_call_operand.vmem [shape: f32[16,64], index: 6, kind: input, shape index: {}]   ;;  %s4016_s7 = inlined_call_operand.vmem [shape: f32[64,1024], index: 7, kind: input, shape index: {}]   ;;  %s4017_s8 = inlined_call_operand.hbm [shape: f32[64,1024], index: 8, kind: input, shape index: {}]   ;;  %s4018_s9 = inlined_call_operand.hbm [shape: f32[8,1024], index: 9, kind: output, shape index: {}]  }
   0x1   :  { %15 = vsyncpa [#allocation4], 0  ;;  %s2818_s30 = smov [#allocation2]   ;;  %s2770_s13 = scalar_lea.hbm %s4017_s8, 8192 }
   0x2   :  { %s37_s10 = sshll.u32 %s2818_s30, 4  ;;  %p2771_p0 = scmp.ne.s32.totalorder %s4017_s8, %s2770_s13  ;;  %s38_s10 = int_to_ptr.vmem [resolvable:$true] %s37_s10 }
   0x3   :  { %p2774_p1 = scmp.lt.u32.totalorder %s2770_s13, %s4017_s8 }
   0x5   :  { %p2776_p2 = pnand %p2774_p1, %p2771_p0 }
   0x7   :  { %2779 = shalt.err (!%p2776_p2)
}
   0x8   :  { %s2780_s18 = scalar_lea.vmem %s38_s10, 8192  ;;  %p2785_p4 = scmp.lt.s32.totalorder %s38_s10, %s38_s10 }
   0x9   :  { %p2781_p3 = scmp.ne.s32.totalorder %s38_s10, %s2780_s18  ;;  %p2786_p5 = scmp.lt.s32.totalorder %s2780_s18, %s2780_s18 }
   0xb   :  { %p2787_p6 = por %p2786_p5, %p2785_p4 }
   0xd   :  { %p2788_p7 = pnand %p2787_p6, %p2781_p3 }
   0xf   :  { %2791 = shalt.err (!%p2788_p7)
}
  0x10   :  { %s2819_s19 = smov 1024   ;;  %s2820_s20 = smov 64  }
  0x11   :  { %43 = dma.hbm_to_vmem [thread:$0]  %s4017_s8, 8192, %s38_s10, [#allocation3], %s2819_s19, %s2819_s19, %s2820_s20  }
  0x12   :  { %2814 = dma.done.wait [#allocation3], 8192  }
  0x13   :  { %2815 = vsyncadd [#allocation3], 4294959104  ;;  %v55_v0 = vld [vmem:[%s4012_s3] sm:$0xff]  ;;  %v56_v1 = vld [vmem:[%s4012_s3 + $0x8] sm:$0xff]  ;;  %vm59_vm0 = vcmask 261120   ;;  %vm662_vm3 = vcmask 130048  }
  0x14   :  { %v189_v2 = vld [vmem:[%s4013_s4] sm:$0xff]  ;;  %v2520_v3 = vpack.c.bf16 %v56_v1, %v55_v0  ;;  %v190_v4 = vld [vmem:[%s4013_s4 + $0x8] sm:$0xff]  ;;  %v57_v5 = vld [vmem:[%s4012_s3 + $0x10] sm:$0xff]  ;;  %vm808_vm10 = vcmask 523264  }
  0x15   :  { %v58_v6 = vld [vmem:[%s4012_s3 + $0x18] sm:$0xff]  ;;  %v2528_v7 = vpack.c.bf16 %v190_v4, %v189_v2  ;;  %v191_v9 = vld [vmem:[%s4013_s4 + $0x10] sm:$0xff]  ;;  %v47_v11 = vld [vmem:[%s4009_s0] sm:$0xff] }
  0x16   :  { %v2524_v8 = vpack.c.bf16 %v58_v6, %v57_v5  ;;  %v192_v10 = vld [vmem:[%s4013_s4 + $0x18] sm:$0xff]  ;;  %2521 = vmatprep.subr.bf16.mxu0 %v2520_v3  ;;  %2472 = vmatprep.mubr.msk.f32.mxu0 %vm59_vm0, %v47_v11  ;;  %v318_v13 = vld [vmem:[%s4014_s5 + $0x80] sm:$0xff]  ;;  %v319_v14 = vld [vmem:[%s4014_s5 + $0x88] sm:$0xff] }
  0x17   :  { %v2532_v12 = vpack.c.bf16 %v192_v10, %v191_v9  ;;  %2529 = vmatprep.subr.bf16.mxu1 %v2528_v7  ;;  %2523 = vmatpush3.bf16.msra.mxu0 %v2520_v3  ;;  %v350_v15 = vld [vmem:[%s4014_s5 + $0x180] sm:$0xff]  ;;  %v351_v16 = vld [vmem:[%s4014_s5 + $0x188] sm:$0xff]  ;;  %v2536_v17 = vpack.c.bf16 %v319_v14, %v318_v13  ;;  %v320_v23 = vld [vmem:[%s4014_s5 + $0x90] sm:$0xff] }
  0x18   :  { %2531 = vmatpush3.bf16.msra.mxu1 %v2528_v7  ;;  %2525 = vmatprep.subr.bf16.mxu0 %v2524_v8  ;;  %v302_v18 = vld [vmem:[%s4014_s5] sm:$0xff]  ;;  %v303_v19 = vld [vmem:[%s4014_s5 + $0x8] sm:$0xff]  ;;  %v2568_v21 = vpack.c.bf16 %v351_v16, %v350_v15  ;;  %v321_v24 = vld [vmem:[%s4014_s5 + $0x98] sm:$0xff] }
  0x19   :  { %v334_v20 = vld [vmem:[%s4014_s5 + $0x100] sm:$0xff]  ;;  %2533 = vmatprep.subr.bf16.mxu1 %v2532_v12  ;;  %2492 = vmatprep.mubr.msk.f32.mxu1 %vm59_vm0, %v47_v11  ;;  %v335_v22 = vld [vmem:[%s4014_s5 + $0x108] sm:$0xff]  ;;  %v352_v25 = vld [vmem:[%s4014_s5 + $0x190] sm:$0xff]  ;;  %v2538_v28 = vpack.c.bf16 %v303_v19, %v302_v18  ;;  %v2540_v30 = vpack.c.bf16 %v321_v24, %v320_v23 }
  0x1a   :  { %v353_v26 = vld [vmem:[%s4014_s5 + $0x198] sm:$0xff]  ;;  %v48_v27 = vld [vmem:[%s4009_s0 + $0x8] sm:$0xff]  ;;  %v2570_v29 = vpack.c.bf16 %v335_v22, %v334_v20  ;;  %v304_v31 = vld [vmem:[%s4014_s5 + $0x10] sm:$0xff] }
  0x1b   :  { %2527 = vmatpush3.bf16.msra.mxu0 %v2524_v8  ;;  %v305_v32 = vld [vmem:[%s4014_s5 + $0x18] sm:$0xff]  ;;  %v336_v33 = vld [vmem:[%s4014_s5 + $0x110] sm:$0xff]  ;;  %v2572_v34 = vpack.c.bf16 %v353_v26, %v352_v25  ;;  %v322_v36 = vld [vmem:[%s4014_s5 + $0xa0] sm:$0xff] }
  0x1c   :  { %2535 = vmatpush3.bf16.msra.mxu1 %v2532_v12  ;;  %2537 = vmatprep.subr.bf16.mxu0 %v2536_v17  ;;  %v337_v35 = vld [vmem:[%s4014_s5 + $0x118] sm:$0xff]  ;;  %v323_v37 = vld [vmem:[%s4014_s5 + $0xa8] sm:$0xff]  ;;  %v354_v38 = vld [vmem:[%s4014_s5 + $0x1a0] sm:$0xff]  ;;  %v2542_v40 = vpack.c.bf16 %v305_v32, %v304_v31 }
  0x1d   :  { %2569 = vmatprep.subr.bf16.mxu1 %v2568_v21  ;;  %v355_v39 = vld [vmem:[%s4014_s5 + $0x1a8] sm:$0xff]  ;;  %v2574_v41 = vpack.c.bf16 %v337_v35, %v336_v33  ;;  %v2544_v42 = vpack.c.bf16 %v323_v37, %v322_v36  ;;  %v306_v43 = vld [vmem:[%s4014_s5 + $0x20] sm:$0xff]  ;;  %v324_v48 = vld [vmem:[%s4014_s5 + $0xb0] sm:$0xff] }
  0x1e   :  { %2473 = vmatmul.mubr.msk.f32.vlgmr.msra.gmra.mrb[0].mxu0 %vm59_vm0, %v48_v27  ;;  %v307_v44 = vld [vmem:[%s4014_s5 + $0x28] sm:$0xff]  ;;  %v338_v45 = vld [vmem:[%s4014_s5 + $0x120] sm:$0xff]  ;;  %v2576_v46 = vpack.c.bf16 %v355_v39, %v354_v38  ;;  %v325_v49 = vld [vmem:[%s4014_s5 + $0xb8] sm:$0xff] }
  0x1f   :  { %2493 = vmatmul.mubr.msk.f32.vlgmr.msra.gmra.mrb[0].mxu1 %vm59_vm0, %v48_v27  ;;  %2539 = vmatpush3.bf16.msra.mxu0 %v2538_v28  ;;  %v339_v47 = vld [vmem:[%s4014_s5 + $0x128] sm:$0xff]  ;;  %v356_v50 = vld [vmem:[%s4014_s5 + $0x1b0] sm:$0xff]  ;;  %v357_v51 = vld [vmem:[%s4014_s5 + $0x1b8] sm:$0xff]  ;;  %v2546_v52 = vpack.c.bf16 %v307_v44, %v306_v43  ;;  %v2548_v56 = vpack.c.bf16 %v325_v49, %v324_v48 }
  0x20   :  { %2571 = vmatpush3.bf16.msra.mxu1 %v2570_v29  ;;  %2541 = vmatprep.subr.bf16.mxu0 %v2540_v30  ;;  %v308_v53 = vld [vmem:[%s4014_s5 + $0x30] sm:$0xff]  ;;  %v2578_v55 = vpack.c.bf16 %v339_v47, %v338_v45  ;;  %v309_v57 = vld [vmem:[%s4014_s5 + $0x38] sm:$0xff]  ;;  %v2580_v60 = vpack.c.bf16 %v357_v51, %v356_v50  ;;  %v326_v62 = vld [vmem:[%s4014_s5 + $0xc0] sm:$0xff] }
  0x21   :  { %2573 = vmatprep.subr.bf16.mxu1 %v2572_v34  ;;  %v49_v54 = vld [vmem:[%s4009_s0 + $0x10] sm:$0xff]  ;;  %v50_v59 = vld [vmem:[%s4009_s0 + $0x18] sm:$0xff]  ;;  %v327_v63 = vld [vmem:[%s4014_s5 + $0xc8] sm:$0xff]  ;;  %v2550_v2 = vpack.c.bf16 %v309_v57, %v308_v53 }
  0x22   :  { %v340_v58 = vld [vmem:[%s4014_s5 + $0x130] sm:$0xff]  ;;  %v341_v61 = vld [vmem:[%s4014_s5 + $0x138] sm:$0xff]  ;;  %2475 = vmatprep.mubr.msk.f32.mxu0 %vm59_vm0, %v49_v54  ;;  %v358_v0 = vld [vmem:[%s4014_s5 + $0x1c0] sm:$0xff]  ;;  %2495 = vmatprep.mubr.msk.f32.mxu1 %vm59_vm0, %v49_v54  ;;  %v2552_v6 = vpack.c.bf16 %v327_v63, %v326_v62  ;;  %v2821_v62 = vmov 0.0  }
  0x23   :  { %2543 = vmatpush3.bf16.msra.mxu0 %v2542_v40  ;;  %v359_v1 = vld [vmem:[%s4014_s5 + $0x1c8] sm:$0xff]  ;;  %2496 = vmatmul.mubr.msk.f32.gmra.mrb[2].mxu1 %vm59_vm0, %v50_v59  ;;  %v51_v3 = vld [vmem:[%s4009_s0 + $0x20] sm:$0xff]  ;;  %v2582_v5 = vpack.c.bf16 %v341_v61, %v340_v58  ;;  %v328_v12 = vld [vmem:[%s4014_s5 + $0xd0] sm:$0xff] }
  0x24   :  { %2575 = vmatpush3.bf16.msra.mxu1 %v2574_v41  ;;  %2545 = vmatprep.subr.bf16.mxu0 %v2544_v42  ;;  %v52_v4 = vld [vmem:[%s4009_s0 + $0x28] sm:$0xff]  ;;  %v310_v7 = vld [vmem:[%s4014_s5 + $0x40] sm:$0xff]  ;;  %v2584_v10 = vpack.c.bf16 %v359_v1, %v358_v0  ;;  %v329_v13 = vld [vmem:[%s4014_s5 + $0xd8] sm:$0xff] }
  0x25   :  { %2577 = vmatprep.subr.bf16.mxu1 %v2576_v46  ;;  %2476 = vmatmul.mubr.msk.f32.gmra.mrb[2].mxu0 %vm59_vm0, %v50_v59  ;;  %v311_v8 = vld [vmem:[%s4014_s5 + $0x48] sm:$0xff]  ;;  %v342_v9 = vld [vmem:[%s4014_s5 + $0x140] sm:$0xff]  ;;  %v360_v14 = vld [vmem:[%s4014_s5 + $0x1d0] sm:$0xff]  ;;  %v2556_v20 = vpack.c.bf16 %v329_v13, %v328_v12 }
  0x26   :  { %v343_v11 = vld [vmem:[%s4014_s5 + $0x148] sm:$0xff]  ;;  %2478 = vmatprep.mubr.msk.f32.mxu0 %vm59_vm0, %v51_v3  ;;  %v361_v15 = vld [vmem:[%s4014_s5 + $0x1d8] sm:$0xff]  ;;  %2498 = vmatprep.mubr.msk.f32.mxu1 %vm59_vm0, %v51_v3  ;;  %v53_v16 = vld [vmem:[%s4009_s0 + $0x30] sm:$0xff]  ;;  %v2554_v17 = vpack.c.bf16 %v311_v8, %v310_v7 }
  0x27   :  { %2547 = vmatpush3.bf16.msra.mxu0 %v2546_v52  ;;  %2499 = vmatmul.mubr.msk.f32.gmra.mrb[4].mxu1 %vm59_vm0, %v52_v4  ;;  %v54_v18 = vld [vmem:[%s4009_s0 + $0x38] sm:$0xff]  ;;  %v2586_v19 = vpack.c.bf16 %v343_v11, %v342_v9  ;;  %v312_v21 = vld [vmem:[%s4014_s5 + $0x50] sm:$0xff]  ;;  %v2588_v24 = vpack.c.bf16 %v361_v15, %v360_v14  ;;  %v330_v26 = vld [vmem:[%s4014_s5 + $0xe0] sm:$0xff] }
  0x28   :  { %2579 = vmatpush3.bf16.msra.mxu1 %v2578_v55  ;;  %2549 = vmatprep.subr.bf16.mxu0 %v2548_v56  ;;  %v313_v22 = vld [vmem:[%s4014_s5 + $0x58] sm:$0xff]  ;;  %v344_v23 = vld [vmem:[%s4014_s5 + $0x150] sm:$0xff]  ;;  %v331_v27 = vld [vmem:[%s4014_s5 + $0xe8] sm:$0xff] }
  0x29   :  { %2581 = vmatprep.subr.bf16.mxu1 %v2580_v60  ;;  %2479 = vmatmul.mubr.msk.f32.gmra.mrb[4].mxu0 %vm59_vm0, %v52_v4  ;;  %v345_v25 = vld [vmem:[%s4014_s5 + $0x158] sm:$0xff]  ;;  %v362_v28 = vld [vmem:[%s4014_s5 + $0x1e0] sm:$0xff]  ;;  %v363_v29 = vld [vmem:[%s4014_s5 + $0x1e8] sm:$0xff]  ;;  %v2558_v31 = vpack.c.bf16 %v313_v22, %v312_v21  ;;  %v2560_v34 = vpack.c.bf16 %v331_v27, %v330_v26 }
  0x2a   :  { %2481 = vmatprep.mubr.msk.f32.mxu0 %vm59_vm0, %v53_v16  ;;  %2501 = vmatprep.mubr.msk.f32.mxu1 %vm59_vm0, %v53_v16  ;;  %v299_v30 = vld [vmem:[%s4010_s1 + $0x8] sm:$0xff]  ;;  %v301_v32 = vld [vmem:[%s4010_s1 + $0x18] sm:$0xff]  ;;  %v2590_v33 = vpack.c.bf16 %v345_v25, %v344_v23  ;;  %v314_v35 = vld [vmem:[%s4014_s5 + $0x60] sm:$0xff]  ;;  %v2592_v38 = vpack.c.bf16 %v363_v29, %v362_v28 }
  0x2b   :  { %2551 = vmatpush3.bf16.msra.mxu0 %v2550_v2  ;;  %2502 = vmatmul.mubr.msk.f32.gmra.mrb[6].mxu1 %vm59_vm0, %v54_v18  ;;  %v315_v36 = vld [vmem:[%s4014_s5 + $0x68] sm:$0xff]  ;;  %v346_v37 = vld [vmem:[%s4014_s5 + $0x160] sm:$0xff]  ;;  %v332_v40 = vld [vmem:[%s4014_s5 + $0xf0] sm:$0xff] }
  0x2c   :  { %2583 = vmatpush3.bf16.msra.mxu1 %v2582_v5  ;;  %2553 = vmatprep.subr.bf16.mxu0 %v2552_v6  ;;  %v347_v39 = vld [vmem:[%s4014_s5 + $0x168] sm:$0xff]  ;;  %v333_v41 = vld [vmem:[%s4014_s5 + $0xf8] sm:$0xff]  ;;  %v364_v42 = vld [vmem:[%s4014_s5 + $0x1f0] sm:$0xff]  ;;  %v2562_v44 = vpack.c.bf16 %v315_v36, %v314_v35 }
  0x2d   :  { %2585 = vmatprep.subr.bf16.mxu1 %v2584_v10  ;;  %2482 = vmatmul.mubr.msk.f32.gmra.mrb[6].mxu0 %vm59_vm0, %v54_v18  ;;  %v365_v43 = vld [vmem:[%s4014_s5 + $0x1f8] sm:$0xff]  ;;  %v2594_v45 = vpack.c.bf16 %v347_v39, %v346_v37  ;;  %v2564_v46 = vpack.c.bf16 %v333_v41, %v332_v40  ;;  %v316_v47 = vld [vmem:[%s4014_s5 + $0x70] sm:$0xff]  ;;  %v660_v52 = vld [vmem:[%s4015_s6] sm:$0xff] }
  0x2e   :  { %430 = vmatprep.mubr.f32.mxu0 %v299_v30  ;;  %500 = vmatprep.mubr.f32.mxu1 %v301_v32  ;;  %v317_v48 = vld [vmem:[%s4014_s5 + $0x78] sm:$0xff]  ;;  %v348_v49 = vld [vmem:[%s4014_s5 + $0x170] sm:$0xff]  ;;  %v2596_v50 = vpack.c.bf16 %v365_v43, %v364_v42  ;;  %v661_v53 = vld [vmem:[%s4015_s6 + $0x8] sm:$0xff] }
  0x2f   :  { %2555 = vmatpush3.bf16.msra.mxu0 %v2554_v17  ;;  %v349_v51 = vld [vmem:[%s4014_s5 + $0x178] sm:$0xff]  ;;  %v2566_v54 = vpack.c.bf16 %v317_v48, %v316_v47  ;;  %v628_v55 = vld [vmem:[%s4011_s2] sm:$0xff]  ;;  %v2600_v57 = vpack.c.bf16 %v661_v53, %v660_v52  ;;  %v629_v58 = vld [vmem:[%s4011_s2 + $0x8] sm:$0xff] }
  0x30   :  { %2587 = vmatpush3.bf16.msra.mxu1 %v2586_v19  ;;  %2557 = vmatprep.subr.bf16.mxu0 %v2556_v20  ;;  %v2598_v56 = vpack.c.bf16 %v349_v51, %v348_v49  ;;  %vm636_vm1 = vcmp.ne.f32.partialorder %v628_v55, 0.0  ;;  %v630_v59 = vld [vmem:[%s4011_s2 + $0x10] sm:$0xff]  ;;  %v298_v60 = vld [vmem:[%s4010_s1] sm:$0xff]  ;;  %vm637_vm2 = vcmp.ne.f32.partialorder %v629_v58, 0.0  ;;  %v631_v0 = vld [vmem:[%s4011_s2 + $0x18] sm:$0xff] }
  0x31   :  { %2589 = vmatprep.subr.bf16.mxu1 %v2588_v24  ;;  %v300_v61 = vld [vmem:[%s4010_s1 + $0x10] sm:$0xff]  ;;  %v2280_v63 = vsel %vm636_vm1, 1.0, %v2821_v62  ;;  %vm638_vm4 = vcmp.ne.f32.partialorder %v630_v59, 0.0  ;;  %v632_v1 = vld [vmem:[%s4011_s2 + $0x20] sm:$0xff]  ;;  %v2281_v2 = vsel %vm637_vm2, 1.0, %v2821_v62  ;;  %vm639_vm5 = vcmp.ne.f32.partialorder %v631_v0, 0.0 }
  0x32   :  { %v2282_v3 = vsel %vm638_vm4, 1.0, %v2821_v62  ;;  %vm640_vm6 = vcmp.ne.f32.partialorder %v632_v1, 0.0  ;;  %v633_v4 = vld [vmem:[%s4011_s2 + $0x28] sm:$0xff]  ;;  %v634_v5 = vld [vmem:[%s4011_s2 + $0x30] sm:$0xff]  ;;  %v2283_v6 = vsel %vm639_vm5, 1.0, %v2821_v62  ;;  %v635_v8 = vld [vmem:[%s4011_s2 + $0x38] sm:$0xff] }
  0x33   :  { %2559 = vmatpush3.bf16.msra.mxu0 %v2558_v31  ;;  %v2284_v7 = vsel %vm640_vm6, 1.0, %v2821_v62  ;;  %vm641_vm7 = vcmp.ne.f32.partialorder %v633_v4, 0.0  ;;  %vm642_vm8 = vcmp.ne.f32.partialorder %v634_v5, 0.0  ;;  %vm643_vm9 = vcmp.ne.f32.partialorder %v635_v8, 0.0  ;;  %v1010_v12 = vld [vmem:[%s4016_s7 + $0x8] sm:$0xff]  ;;  %v1012_v14 = vld [vmem:[%s4016_s7 + $0x18] sm:$0xff] }
  0x34   :  { %2591 = vmatpush3.bf16.msra.mxu1 %v2590_v33  ;;  %2561 = vmatprep.subr.bf16.mxu0 %v2560_v34  ;;  %v2285_v9 = vsel %vm641_vm7, 1.0, %v2821_v62  ;;  %v2286_v10 = vsel %vm642_vm8, 1.0, %v2821_v62  ;;  %v2287_v11 = vsel %vm643_vm9, 1.0, %v2821_v62  ;;  %v1018_v13 = vld [vmem:[%s4016_s7 + $0x48] sm:$0xff]  ;;  %v1020_v16 = vld [vmem:[%s4016_s7 + $0x58] sm:$0xff]  ;;  %v1009_v17 = vld [vmem:[%s4016_s7] sm:$0xff] }
  0x35   :  { %2593 = vmatprep.subr.bf16.mxu1 %v2592_v38  ;;  %v2604_v15 = vpack.c.bf16 %v1018_v13, %v1010_v12  ;;  %v1017_v18 = vld [vmem:[%s4016_s7 + $0x40] sm:$0xff]  ;;  %v2620_v19 = vpack.c.bf16 %v1020_v16, %v1012_v14  ;;  %v1011_v21 = vld [vmem:[%s4016_s7 + $0x10] sm:$0xff]  ;;  %v1026_v27 = vld [vmem:[%s4016_s7 + $0x88] sm:$0xff] }
  0x36   :  { %v2606_v20 = vpack.c.bf16 %v1017_v18, %v1009_v17  ;;  %v1019_v22 = vld [vmem:[%s4016_s7 + $0x50] sm:$0xff]  ;;  %v1034_v28 = vld [vmem:[%s4016_s7 + $0xc8] sm:$0xff]  ;;  %v1028_v29 = vld [vmem:[%s4016_s7 + $0x98] sm:$0xff] }
  0x37   :  { %2563 = vmatpush3.bf16.msra.mxu0 %v2562_v44  ;;  %v2622_v24 = vpack.c.bf16 %v1019_v22, %v1011_v21  ;;  %v2608_v31 = vpack.c.bf16 %v1034_v28, %v1026_v27  ;;  %v1036_v32 = vld [vmem:[%s4016_s7 + $0xd8] sm:$0xff]  ;;  %v1025_v33 = vld [vmem:[%s4016_s7 + $0x80] sm:$0xff]  ;;  %v1027_v37 = vld [vmem:[%s4016_s7 + $0x90] sm:$0xff]  ;;  %v511_v21 = vlaneseq }
  0x38   :  { %2595 = vmatpush3.bf16.msra.mxu1 %v2594_v45  ;;  %2565 = vmatprep.subr.bf16.mxu0 %v2564_v46  ;;  %v1033_v34 = vld [vmem:[%s4016_s7 + $0xc0] sm:$0xff]  ;;  %v2624_v35 = vpack.c.bf16 %v1036_v32, %v1028_v29  ;;  %v1035_v38 = vld [vmem:[%s4016_s7 + $0xd0] sm:$0xff]  ;;  %v1042_v40 = vld [vmem:[%s4016_s7 + $0x108] sm:$0xff] }
  0x39   :  { %2597 = vmatprep.subr.bf16.mxu1 %v2596_v50  ;;  %v2610_v36 = vpack.c.bf16 %v1033_v34, %v1025_v33  ;;  %v2626_v39 = vpack.c.bf16 %v1035_v38, %v1027_v37  ;;  %v1050_v41 = vld [vmem:[%s4016_s7 + $0x148] sm:$0xff]  ;;  %v1044_v42 = vld [vmem:[%s4016_s7 + $0x118] sm:$0xff]  ;;  %v1041_v45 = vld [vmem:[%s4016_s7 + $0x100] sm:$0xff] }
  0x3a   :  { %v2612_v43 = vpack.c.bf16 %v1050_v41, %v1042_v40  ;;  %v1052_v44 = vld [vmem:[%s4016_s7 + $0x158] sm:$0xff]  ;;  %v1049_v46 = vld [vmem:[%s4016_s7 + $0x140] sm:$0xff]  ;;  %v1043_v49 = vld [vmem:[%s4016_s7 + $0x110] sm:$0xff] }
  0x3b   :  { %2567 = vmatpush3.bf16.msra.mxu0 %v2566_v54  ;;  %v2628_v47 = vpack.c.bf16 %v1052_v44, %v1044_v42  ;;  %v2614_v48 = vpack.c.bf16 %v1049_v46, %v1041_v45  ;;  %v1051_v50 = vld [vmem:[%s4016_s7 + $0x150] sm:$0xff]  ;;  %v1058_v55 = vld [vmem:[%s4016_s7 + $0x188] sm:$0xff]  ;;  %v1024_v17 = vld [vmem:[%s4016_s7 + $0x78] sm:$0xff] }
  0x3c   :  { %2599 = vmatpush3.bf16.msra.mxu1 %v2598_v56  ;;  %2601 = vmatprep.subr.bf16.mxu0 %v2600_v57  ;;  %v2630_v52 = vpack.c.bf16 %v1051_v50, %v1043_v49  ;;  %v1066_v56 = vld [vmem:[%s4016_s7 + $0x1c8] sm:$0xff] }
  0x3d   :  { %2605 = vmatprep.subr.bf16.mxu1 %v2604_v15  ;;  %v2616_v59 = vpack.c.bf16 %v1066_v56, %v1058_v55  ;;  %v1014_v13 = vld [vmem:[%s4016_s7 + $0x28] sm:$0xff]  ;;  %v1016_v15 = vld [vmem:[%s4016_s7 + $0x38] sm:$0xff] }
  0x3e   :  { %431 = vmatmul.mubr.f32.vlgmr.msra.gmra.mrb[8].mxu0 %v298_v60  ;;  %v1068_v60 = vld [vmem:[%s4016_s7 + $0x1d8] sm:$0xff]  ;;  %v1022_v14 = vld [vmem:[%s4016_s7 + $0x68] sm:$0xff]  ;;  %v2652_v18 = vpack.c.bf16 %v1024_v17, %v1016_v15 }
  0x3f   :  { %501 = vmatmul.mubr.f32.vlgmr.msra.gmra.mrb[8].mxu1 %v300_v61  ;;  %2603 = vmatpush3.bf16.msra.mxu0 %v2600_v57  ;;  %v1060_v57 = vld [vmem:[%s4016_s7 + $0x198] sm:$0xff]  ;;  %v1057_v61 = vld [vmem:[%s4016_s7 + $0x180] sm:$0xff]  ;;  %v2636_v16 = vpack.c.bf16 %v1022_v14, %v1014_v13 }
  0x40   :  { %2508 = vmatprep.mubr.msk.f32.mxu0 %vm662_vm3, %v2280_v63  ;;  %1161 = vmatprep.mubr.f32.mxu1 %v2821_v62  ;;  %v1065_v63 = vld [vmem:[%s4016_s7 + $0x1c0] sm:$0xff]  ;;  %v2632_v0 = vpack.c.bf16 %v1068_v60, %v1060_v57 }
  0x41   :  { %2621 = vmatprep.subr.bf16.mxu0 %v2620_v19  ;;  %2607 = vmatpush1.bf16.msra.mxu1 %v2606_v20  ;;  %v2618_v1 = vpack.c.bf16 %v1065_v63, %v1057_v61  ;;  %v2822_v19 = vmov 1966171168  }
  0x42   :  { %2509 = vmatmul.mubr.msk.f32.vlgmr.msra.gmra.mrb[10].mxu0 %vm662_vm3, %v2281_v2  ;;  %2609 = vmatprep.subr.bf16.mxu1 %v2608_v31  ;;  %v1059_v2 = vld [vmem:[%s4016_s7 + $0x190] sm:$0xff]  ;;  %v509_v20 = vunpack.c.l.s4 %v2822_v19 }
  0x43   :  { %2511 = vmatprep.mubr.msk.f32.mxu0 %vm662_vm3, %v2282_v3  ;;  %2623 = vmatpush1.bf16.msra.mxu0 %v2622_v24  ;;  %v1067_v3 = vld [vmem:[%s4016_s7 + $0x1d0] sm:$0xff]  ;;  %v512_v24 = vshrl.u32 %v511_v21, 7 }
  0x44   :  { %2625 = vmatprep.subr.bf16.mxu0 %v2624_v35  ;;  %v2634_v5 = vpack.c.bf16 %v1067_v3, %v1059_v2  ;;  %v510_v22 = vunpack.c.0.s8 %v509_v20 }
  0x45   :  { %2611 = vmatpush1.bf16.msra.mxu1 %v2610_v36  ;;  %v3346_v40 = vsub.s32 0, %v512_v24 }
  0x46   :  { %2512 = vmatmul.mubr.msk.f32.gmra.mrb[12].mxu0 %vm662_vm3, %v2283_v6  ;;  %2613 = vmatprep.subr.bf16.mxu1 %v2612_v43  ;;  %v513_v34 = vsub.s32 %v510_v22, %v512_v24 }
  0x47   :  { %2514 = vmatprep.mubr.msk.f32.mxu0 %vm662_vm3, %v2284_v7  ;;  %2627 = vmatpush1.bf16.msra.mxu0 %v2626_v39 }
  0x48   :  { %2629 = vmatprep.subr.bf16.mxu0 %v2628_v47 }
  0x49   :  { %2615 = vmatpush1.bf16.msra.mxu1 %v2614_v48 }
  0x4a   :  { %2515 = vmatmul.mubr.msk.f32.gmra.mrb[14].mxu0 %vm662_vm3, %v2285_v9  ;;  %2617 = vmatprep.subr.bf16.mxu1 %v2616_v59 }
  0x4b   :  { %2517 = vmatprep.mubr.msk.f32.mxu0 %vm662_vm3, %v2286_v10  ;;  %2631 = vmatpush1.bf16.msra.mxu0 %v2630_v52 }
  0x4c   :  { %2633 = vmatprep.subr.bf16.mxu0 %v2632_v0 }
  0x4d   :  { %2619 = vmatpush1.bf16.msra.mxu1 %v2618_v1 }
  0x4e   :  { %2518 = vmatmul.mubr.msk.f32.gmra.mrb[16].mxu0 %vm662_vm3, %v2287_v11  ;;  %2637 = vmatprep.subr.bf16.mxu1 %v2636_v16 }
  0x4f   :  { %1274 = vmatprep.mubr.f32.mxu0 %v2821_v62  ;;  %2635 = vmatpush1.bf16.msra.mxu0 %v2634_v5 }
  0x50   :  { %2653 = vmatprep.subr.bf16.mxu0 %v2652_v18 }
  0xf1   :  { %v3226_v23 = vpop.f32.mrb[0].mxu0 }
  0xf2   :  { %v3228_v25 = vpop.f32.mrb[0].mxu1  ;;  %v3230_v26 = vpop.f32.mrb[1].mxu0 }
  0xf3   :  { %v3241_v30 = vpop.f32.mrb[1].mxu1 }
  0xf6   :  { %v3284_v53 = vpop.f32.mrb[2].mxu1 }
  0xf7   :  { %v3297_v58 = vpop.f32.mrb[3].mxu1 }
  0xf8   :  { %v3282_v51 = vpop.f32.mrb[2].mxu0 }
  0xf9   :  { %v3286_v54 = vpop.f32.mrb[3].mxu0 }
  0xfa   :  { %v3316_v6 = vpop.f32.mrb[4].mxu1 }
  0xfb   :  { %v3320_v8 = vpop.f32.mrb[5].mxu1 }
  0xfc   :  { %v3314_v4 = vpop.f32.mrb[4].mxu0 }
  0xfd   :  { %v3318_v7 = vpop.f32.mrb[5].mxu0 }
  0xfe   :  { %v3324_v10 = vpop.f32.mrb[6].mxu1 }
  0xff   :  { %v3328_v12 = vpop.f32.mrb[7].mxu1 }
 0x100   :  { %v3322_v9 = vpop.f32.mrb[6].mxu0 }
 0x101   :  { %v3326_v11 = vpop.f32.mrb[7].mxu0 }
 0x111   :  { %v2416_v27 = vpop.f32.mrb[8].mxu0 }
 0x112   :  { %v2451_v28 = vpop.f32.mrb[8].mxu1  ;;  %v2417_v29 = vpop.f32.mrb[9].mxu0 }
 0x113   :  { %v2418_v31 = vadd.f32 %v2417_v29, %v2416_v27  ;;  %v2452_v32 = vpop.f32.mrb[9].mxu1 }
 0x114   :  { %v2453_v33 = vadd.f32 %v2452_v32, %v2451_v28 }
 0x115   :  { %v3342_v35 = vpop.f32.mrb[10].mxu0 }
 0x116   :  { %v503_v36 = vadd.f32 %v2453_v33, %v2418_v31  ;;  %v3344_v37 = vpop.f32.mrb[11].mxu0  ;;  %vm793_vm11 = vcmp.lt.f32.partialorder %v3342_v35, 0.5 }
 0x117   :  { %vm792_vm12 = vcmp.lt.f32.partialorder %v3344_v37, 0.5 }
 0x118   :  { %v507_v38 = vcombine.high %v503_v36, %v503_v36  ;;  %v514_v39 = vrot.slane %v503_v36, %v513_v34 }
 0x119   :  { %v3348_v41 = vpop.f32.mrb[12].mxu0 }
 0x11a   :  { %v521_v42 = vrot.slane %v507_v38, %v513_v34  ;;  %v522_v43 = vcombine.high %v514_v39, %v514_v39  ;;  %v530_v44 = vrot.slane %v514_v39, %v513_v34  ;;  %v3350_v45 = vpop.f32.mrb[13].mxu0  ;;  %vm795_vm13 = vcmp.lt.f32.partialorder %v3348_v41, 0.5 }
 0x11b   :  { %vm794_vm14 = vcmp.lt.f32.partialorder %v3350_v45, 0.5 }
 0x11c   :  { %v523_v46 = vcombine.high %v521_v42, %v521_v42  ;;  %v3352_v47 = vrot.slane %v521_v42, %v513_v34  ;;  %v544_v48 = vrot.slane %v522_v43, %v513_v34  ;;  %v552_v49 = vcombine.high %v530_v44, %v530_v44 }
 0x11d   :  { %v559_v50 = vrot.slane %v530_v44, %v3346_v40  ;;  %v3359_v52 = vpop.f32.mrb[14].mxu0 }
 0x11e   :  { %v3361_v55 = vrot.slane %v523_v46, %v513_v34  ;;  %v553_v56 = vcombine.high %v3352_v47, %v3352_v47  ;;  %v554_v57 = vcombine.high %v544_v48, %v544_v48  ;;  %v563_v59 = vrot.slane %v544_v48, %v3346_v40  ;;  %v3366_v60 = vpop.f32.mrb[15].mxu0 }
 0x11f   :  { %v596_v61 = vadd.f32 %v559_v50, %v3241_v30  ;;  %v567_v63 = vrot.slane %v552_v49, %v3346_v40  ;;  %vm797_vm15 = vcmp.lt.f32.partialorder %v3359_v52, 0.5  ;;  %v575_v0 = vrot.slane %v3352_v47, %v3346_v40 }
 0x120   :  { %v597_v1 = vadd.f32 %v3228_v25, %v563_v59  ;;  %v571_v2 = vrot.slane %v554_v57, %v3346_v40  ;;  %v579_v3 = vrot.slane %v3361_v55, %v3346_v40  ;;  %vm796_vm0 = vcmp.lt.f32.partialorder %v3366_v60, 0.5 }
 0x121   :  { %vm604_vm1 = vcmp.gt.f32.partialorder %v596_v61, 0.0  ;;  %v612_v5 = vmul.f32 0.2, %v596_v61  ;;  %v598_v30 = vadd.f32 %v567_v63, %v3297_v58  ;;  %v600_v13 = vadd.f32 %v575_v0, %v3320_v8  ;;  %v3380_v14 = vpop.f32.mrb[16].mxu0 }
 0x122   :  { %vm605_vm2 = vcmp.gt.f32.partialorder %v597_v1, 0.0  ;;  %v613_v15 = vmul.f32 0.2, %v597_v1  ;;  %v599_v16 = vadd.f32 %v3284_v53, %v571_v2  ;;  %v601_v25 = vadd.f32 %v3316_v6, %v579_v3  ;;  %v3384_v17 = vpop.f32.mrb[17].mxu0 }
 0x123   :  { %v620_v18 = vsel %vm604_vm1, %v596_v61, %v612_v5  ;;  %vm606_vm3 = vcmp.gt.f32.partialorder %v598_v30, 0.0  ;;  %v614_v19 = vmul.f32 0.2, %v598_v30  ;;  %vm608_vm4 = vcmp.gt.f32.partialorder %v600_v13, 0.0 }
 0x124   :  { %v621_v20 = vsel %vm605_vm2, %v597_v1, %v613_v15  ;;  %v3388_v58 = vsel %vm792_vm12, -1e+30, %v620_v18  ;;  %vm607_vm5 = vcmp.gt.f32.partialorder %v599_v16, 0.0  ;;  %v615_v8 = vmul.f32 0.2, %v599_v16 }
 0x125   :  { %v3392_v21 = vsel %vm793_vm11, -1e+30, %v621_v20  ;;  %v809_v53 = vsel %vm808_vm10, %v3388_v58, -inf  ;;  %v622_v6 = vsel %vm606_vm3, %v598_v30, %v614_v19  ;;  %vm609_vm6 = vcmp.gt.f32.partialorder %v601_v25, 0.0 }
 0x126   :  { %v816_v22 = vsel %vm808_vm10, %v3392_v21, -inf  ;;  %v810_v24 = vrot.slane %v809_v53, 4  ;;  %v623_v27 = vsel %vm607_vm5, %v599_v16, %v615_v8  ;;  %v802_v28 = vsel %vm794_vm14, -1e+30, %v622_v6 }
 0x127   :  { %v817_v29 = vrot.slane %v816_v22, 4  ;;  %v3402_v31 = vsel %vm795_vm13, -1e+30, %v623_v27  ;;  %v823_v32 = vsel %vm808_vm10, %v802_v28, -inf  ;;  %v617_v33 = vmul.f32 0.2, %v601_v25 }
 0x128   :  { %v811_v34 = vmax.f32 %v809_v53, %v810_v24  ;;  %v830_v36 = vsel %vm808_vm10, %v3402_v31, -inf  ;;  %v824_v38 = vrot.slane %v823_v32, 4  ;;  %v616_v39 = vmul.f32 0.2, %v600_v13 }
 0x129   :  { %v818_v42 = vmax.f32 %v816_v22, %v817_v29  ;;  %v831_v43 = vrot.slane %v830_v36, 4  ;;  %v625_v44 = vsel %vm609_vm6, %v601_v25, %v617_v33  ;;  %v555_v46 = vcombine.high %v3361_v55, %v3361_v55 }
 0x12a   :  { %v812_v48 = vrot.slane %v811_v34, 2  ;;  %v825_v49 = vmax.f32 %v823_v32, %v824_v38  ;;  %v805_v50 = vsel %vm797_vm15, -1e+30, %v625_v44  ;;  %v624_v57 = vsel %vm608_vm4, %v600_v13, %v616_v39 }
 0x12b   :  { %v819_v59 = vrot.slane %v818_v42, 2  ;;  %v832_v61 = vmax.f32 %v830_v36, %v831_v43  ;;  %v844_v63 = vsel %vm808_vm10, %v805_v50, -inf  ;;  %v804_v0 = vsel %vm796_vm0, -1e+30, %v624_v57 }
 0x12c   :  { %v813_v1 = vmax.f32 %v811_v34, %v812_v48  ;;  %v826_v2 = vrot.slane %v825_v49, 2  ;;  %v845_v3 = vrot.slane %v844_v63, 4  ;;  %v837_v5 = vsel %vm808_vm10, %v804_v0, -inf }
 0x12d   :  { %v820_v55 = vmax.f32 %v818_v42, %v819_v59  ;;  %v833_v30 = vrot.slane %v832_v61, 2  ;;  %v838_v15 = vrot.slane %v837_v5, 4  ;;  %v587_v16 = vrot.slane %v555_v46, %v3346_v40 }
 0x12e   :  { %v814_v25 = vrot.slane %v813_v1, 1  ;;  %v827_v18 = vmax.f32 %v825_v49, %v826_v2  ;;  %v846_v13 = vmax.f32 %v844_v63, %v845_v3  ;;  %vm799_vm7 = vcmp.lt.f32.partialorder %v3380_v14, 0.5 }
 0x12f   :  { %v821_v19 = vrot.slane %v820_v55, 1  ;;  %v834_v20 = vmax.f32 %v832_v61, %v833_v30  ;;  %v839_v8 = vmax.f32 %v837_v5, %v838_v15  ;;  %v603_v53 = vadd.f32 %v3324_v10, %v587_v16 }
 0x130   :  { %v815_v6 = vmax.f32 %v813_v1, %v814_v25  ;;  %v828_v22 = vrot.slane %v827_v18, 1  ;;  %v847_v24 = vrot.slane %v846_v13, 2  ;;  %v583_v27 = vrot.slane %v553_v56, %v3346_v40 }
 0x131   :  { %v822_v29 = vmax.f32 %v820_v55, %v821_v19  ;;  %v835_v32 = vrot.slane %v834_v20, 1  ;;  %v840_v33 = vrot.slane %v839_v8, 2  ;;  %vm611_vm8 = vcmp.gt.f32.partialorder %v603_v53, 0.0 }
 0x132   :  { %v865_v34 = vsub.f32 %v3388_v58, %v815_v6  ;;  %v829_v36 = vmax.f32 %v827_v18, %v828_v22  ;;  %v848_v38 = vmax.f32 %v846_v13, %v847_v24  ;;  %v619_v39 = vmul.f32 0.2, %v603_v53 }
 0x133   :  { %v866_v42 = vsub.f32 %v3392_v21, %v822_v29  ;;  %v836_v10 = vmax.f32 %v834_v20, %v835_v32  ;;  %v841_v43 = vmax.f32 %v839_v8, %v840_v33  ;;  %v602_v44 = vadd.f32 %v583_v27, %v3328_v12 }
 0x134   :  { %v873_v46 = vmul.f32 1.442695, %v865_v34  ;;  %v867_v48 = vsub.f32 %v802_v28, %v829_v36  ;;  %v849_v49 = vrot.slane %v848_v38, 1  ;;  %v627_v47 = vsel %vm611_vm8, %v603_v53, %v619_v39 }
 0x135   :  { %v875_v40 = vmul.f32 1.442695, %v866_v42  ;;  %v868_v56 = vsub.f32 %v3402_v31, %v836_v10  ;;  %v842_v57 = vrot.slane %v841_v43, 1  ;;  %v807_v58 = vsel %vm799_vm7, -1e+30, %v627_v47 }
 0x136   :  { %2738 = vpow2.f32 %v873_v46  ;;  %v877_v59 = vmul.f32 1.442695, %v867_v48  ;;  %v850_v61 = vmax.f32 %v848_v38, %v849_v49  ;;  %v858_v21 = vsel %vm808_vm10, %v807_v58, -inf }
 0x137   :  { %2740 = vpow2.f32 %v875_v40  ;;  %v879_v63 = vmul.f32 1.442695, %v868_v56  ;;  %v843_v1 = vmax.f32 %v841_v43, %v842_v57  ;;  %v859_v12 = vrot.slane %v858_v21, 4 }
 0x138   :  { %2742 = vpow2.f32 %v877_v59  ;;  %v870_v28 = vsub.f32 %v805_v50, %v850_v61  ;;  %vm610_vm9 = vcmp.gt.f32.partialorder %v602_v44, 0.0  ;;  %v618_v2 = vmul.f32 0.2, %v602_v44 }
 0x139   :  { %2744 = vpow2.f32 %v879_v63  ;;  %v869_v3 = vsub.f32 %v804_v0, %v843_v1  ;;  %v860_v31 = vmax.f32 %v858_v21, %v859_v12  ;;  %vm798_vm1 = vcmp.lt.f32.partialorder %v3384_v17, 0.5 }
 0x13a   :  { %v883_v5 = vmul.f32 1.442695, %v870_v28  ;;  %v626_v55 = vsel %vm610_vm9, %v602_v44, %v618_v2 }
 0x13b   :  { %v881_v30 = vmul.f32 1.442695, %v869_v3  ;;  %v861_v15 = vrot.slane %v860_v31, 2  ;;  %v3433_v16 = vsel %vm798_vm1, -1e+30, %v626_v55 }
 0x13c   :  { %2746 = vpow2.f32 %v883_v5  ;;  %v851_v25 = vsel %vm808_vm10, %v3433_v16, -inf }
 0x13d   :  { %2748 = vpow2.f32 %v881_v30  ;;  %v862_v50 = vmax.f32 %v860_v31, %v861_v15  ;;  %v852_v18 = vrot.slane %v851_v25, 4 }
 0x13f   :  { %v863_v13 = vrot.slane %v862_v50, 1  ;;  %v853_v0 = vmax.f32 %v851_v25, %v852_v18 }
 0x140   :  { %v2739_v19 = vpop.eup %2738 }
 0x141   :  { %v2741_v20 = vpop.eup %2740  ;;  %v3439_v8 = vsel %vm792_vm12, 0.0, %v2739_v19  ;;  %v864_v53 = vmax.f32 %v862_v50, %v863_v13  ;;  %v854_v6 = vrot.slane %v853_v0, 2 }
 0x142   :  { %v2743_v22 = vpop.eup %2742  ;;  %v3443_v24 = vsel %vm793_vm11, 0.0, %v2741_v20  ;;  %v897_v27 = vsel %vm808_vm10, %v3439_v8, 0.0 }
 0x143   :  { %v2745_v29 = vpop.eup %2744  ;;  %v904_v32 = vsel %vm808_vm10, %v3443_v24, 0.0  ;;  %v898_v33 = vrot.slane %v897_v27, 4  ;;  %v3451_v37 = vsel %vm794_vm14, 0.0, %v2743_v22  ;;  %v872_v34 = vsub.f32 %v807_v58, %v864_v53 }
 0x144   :  { %v905_v36 = vrot.slane %v904_v32, 4  ;;  %v3455_v38 = vsel %vm795_vm13, 0.0, %v2745_v29  ;;  %v911_v35 = vsel %vm808_vm10, %v3451_v37, 0.0  ;;  %v855_v39 = vmax.f32 %v853_v0, %v854_v6 }
 0x145   :  { %v899_v42 = vadd.f32 %v898_v33, %v897_v27  ;;  %v918_v10 = vsel %vm808_vm10, %v3455_v38, 0.0  ;;  %v912_v43 = vrot.slane %v911_v35, 4  ;;  %v887_v44 = vmul.f32 1.442695, %v872_v34 }
 0x146   :  { %v2747_v46 = vpop.eup %2746  ;;  %v906_v45 = vadd.f32 %v905_v36, %v904_v32  ;;  %v919_v48 = vrot.slane %v918_v10, 4  ;;  %v856_v49 = vrot.slane %v855_v39, 1 }
 0x147   :  { %v2749_v47 = vpop.eup %2748  ;;  %v900_v40 = vrot.slane %v899_v42, 2  ;;  %v913_v56 = vadd.f32 %v912_v43, %v911_v35  ;;  %v3463_v41 = vsel %vm797_vm15, 0.0, %v2747_v46  ;;  %2750 = vpow2.f32 %v887_v44 }
 0x148   :  { %v907_v57 = vrot.slane %v906_v45, 2  ;;  %v920_v58 = vadd.f32 %v919_v48, %v918_v10  ;;  %v932_v59 = vsel %vm808_vm10, %v3463_v41, 0.0  ;;  %v3469_v61 = vsel %vm796_vm0, 0.0, %v2749_v47 }
 0x149   :  { %v901_v21 = vadd.f32 %v900_v40, %v899_v42  ;;  %v914_v63 = vrot.slane %v913_v56, 2  ;;  %v933_v1 = vrot.slane %v932_v59, 4  ;;  %v925_v12 = vsel %vm808_vm10, %v3469_v61, 0.0 }
 0x14a   :  { %v908_v28 = vadd.f32 %v907_v57, %v906_v45  ;;  %v921_v52 = vrot.slane %v920_v58, 2  ;;  %v926_v2 = vrot.slane %v925_v12, 4  ;;  %v857_v3 = vmax.f32 %v855_v39, %v856_v49 }
 0x14b   :  { %v902_v31 = vrot.slane %v901_v21, 1  ;;  %v915_v5 = vadd.f32 %v914_v63, %v913_v56  ;;  %v934_v55 = vadd.f32 %v933_v1, %v932_v59  ;;  %v1021_v63 = vld [vmem:[%s4016_s7 + $0x60] sm:$0xff] }
 0x14c   :  { %v909_v30 = vrot.slane %v908_v28, 1  ;;  %v922_v15 = vadd.f32 %v921_v52, %v920_v58  ;;  %v927_v25 = vadd.f32 %v926_v2, %v925_v12  ;;  %v871_v60 = vsub.f32 %v3433_v16, %v857_v3  ;;  %v1015_v2 = vld [vmem:[%s4016_s7 + $0x30] sm:$0xff] }
 0x14d   :  { %v903_v50 = vadd.f32 %v902_v31, %v901_v21  ;;  %v916_v18 = vrot.slane %v915_v5, 1  ;;  %v935_v13 = vrot.slane %v934_v55, 2  ;;  %v1013_v21 = vld [vmem:[%s4016_s7 + $0x20] sm:$0xff]  ;;  %v1023_v3 = vld [vmem:[%s4016_s7 + $0x70] sm:$0xff] }
 0x14e   :  { %v910_v0 = vadd.f32 %v909_v30, %v908_v28  ;;  %v923_v19 = vrot.slane %v922_v15, 1  ;;  %v928_v20 = vrot.slane %v927_v25, 2  ;;  %v885_v22 = vmul.f32 1.442695, %v871_v60  ;;  %v1038_v60 = vld [vmem:[%s4016_s7 + $0xe8] sm:$0xff] }
 0x14f   :  { %vm953_vm11 = vcmp.eq.f32.partialorder %v903_v50, 0.0  ;;  %v917_v53 = vadd.f32 %v916_v18, %v915_v5  ;;  %v936_v6 = vadd.f32 %v935_v13, %v934_v55  ;;  %v1030_v55 = vld [vmem:[%s4016_s7 + $0xa8] sm:$0xff]  ;;  %v1040_v18 = vld [vmem:[%s4016_s7 + $0xf8] sm:$0xff] }
 0x150   :  { %vm954_vm12 = vcmp.eq.f32.partialorder %v910_v0, 0.0  ;;  %v961_v27 = vsel %vm953_vm11, 1.0, %v903_v50  ;;  %v924_v29 = vadd.f32 %v923_v19, %v922_v15  ;;  %v929_v32 = vadd.f32 %v928_v20, %v927_v25  ;;  %v1032_v50 = vld [vmem:[%s4016_s7 + $0xb8] sm:$0xff]  ;;  %v1029_v20 = vld [vmem:[%s4016_s7 + $0xa0] sm:$0xff] }
 0x151   :  { %v2751_v33 = vpop.eup %2750  ;;  %v962_v34 = vsel %vm954_vm12, 1.0, %v910_v0  ;;  %2752 = vrcp.f32 %v961_v27  ;;  %vm955_vm13 = vcmp.eq.f32.partialorder %v917_v53, 0.0  ;;  %v937_v36 = vrot.slane %v936_v6, 1 }
 0x152   :  { %2754 = vrcp.f32 %v962_v34  ;;  %vm956_vm14 = vcmp.eq.f32.partialorder %v924_v29, 0.0  ;;  %v963_v16 = vsel %vm955_vm13, 1.0, %v917_v53  ;;  %v930_v35 = vrot.slane %v929_v32, 1 }
 0x153   :  { %v964_v39 = vsel %vm956_vm14, 1.0, %v924_v29  ;;  %2756 = vrcp.f32 %v963_v16  ;;  %v938_v42 = vadd.f32 %v937_v36, %v936_v6  ;;  %v3476_v10 = vsel %vm799_vm7, 0.0, %v2751_v33  ;;  %v1031_v29 = vld [vmem:[%s4016_s7 + $0xb0] sm:$0xff] }
 0x154   :  { %2758 = vrcp.f32 %v964_v39  ;;  %v931_v43 = vadd.f32 %v930_v35, %v929_v32  ;;  %v946_v44 = vsel %vm808_vm10, %v3476_v10, 0.0  ;;  %v2638_v25 = vpack.c.bf16 %v1021_v63, %v1013_v21  ;;  %v1039_v32 = vld [vmem:[%s4016_s7 + $0xf0] sm:$0xff]  ;;  %v1054_v35 = vld [vmem:[%s4016_s7 + $0x168] sm:$0xff] }
 0x155   :  { %v947_v46 = vrot.slane %v946_v44, 4  ;;  %2760 = vpow2.f32 %v885_v22  ;;  %vm958_vm15 = vcmp.eq.f32.partialorder %v938_v42, 0.0  ;;  %v2654_v19 = vpack.c.bf16 %v1023_v3, %v1015_v2  ;;  %v1062_v63 = vld [vmem:[%s4016_s7 + $0x1a8] sm:$0xff]  ;;  %v1072_v2 = vld [vmem:[%s4016_s7 + $0x1f8] sm:$0xff] }
 0x156   :  { %vm957_vm0 = vcmp.eq.f32.partialorder %v931_v43, 0.0  ;;  %v3480_v49 = vsel %vm958_vm15, 1.0, %v938_v42  ;;  %v2656_v36 = vpack.c.bf16 %v1040_v18, %v1032_v50  ;;  %v1056_v42 = vld [vmem:[%s4016_s7 + $0x178] sm:$0xff]  ;;  %v1069_v18 = vld [vmem:[%s4016_s7 + $0x1e0] sm:$0xff] }
 0x157   :  { %v965_v45 = vsel %vm957_vm0, 1.0, %v931_v43  ;;  %v948_v48 = vadd.f32 %v947_v46, %v946_v44 }
 0x158   :  { %2762 = vrcp.f32 %v965_v45 }
 0x159   :  { %v949_v47 = vrot.slane %v948_v48, 2  ;;  %2764 = vrcp.f32 %v3480_v49 }
 0x15b   :  { %v2753_v40 = vpop.eup %2752  ;;  %v950_v56 = vadd.f32 %v949_v47, %v948_v48  ;;  %v2658_v48 = vpack.c.bf16 %v1039_v32, %v1031_v29  ;;  %v1045_v47 = vld [vmem:[%s4016_s7 + $0x120] sm:$0xff] }
 0x15c   :  { %v2755_v14 = vpop.eup %2754  ;;  %v977_v57 = vmul.f32 %v2753_v40, %v961_v27  ;;  %v1037_v27 = vld [vmem:[%s4016_s7 + $0xe0] sm:$0xff] }
 0x15d   :  { %v2757_v58 = vpop.eup %2756  ;;  %v978_v59 = vmul.f32 %v2755_v14, %v962_v34  ;;  %v951_v52 = vrot.slane %v950_v56, 1  ;;  %v2640_v34 = vpack.c.bf16 %v1038_v60, %v1030_v55  ;;  %v2642_v46 = vpack.c.bf16 %v1037_v27, %v1029_v20  ;;  %v1558_v20 = vld [vmem:[#allocation2 + $0x48] sm:$0xff] }
 0x15e   :  { %v3489_v1 = vpop.eup %2758  ;;  %v985_v12 = vsub.f32 2.0, %v977_v57  ;;  %v979_v28 = vmul.f32 %v2757_v58, %v963_v16 }
 0x15f   :  { %v2761_v31 = vpop.eup %2760  ;;  %v986_v5 = vsub.f32 2.0, %v978_v59  ;;  %v980_v13 = vmul.f32 %v3489_v1, %v964_v39  ;;  %v952_v22 = vadd.f32 %v951_v52, %v950_v56  ;;  %v1048_v39 = vld [vmem:[%s4016_s7 + $0x138] sm:$0xff]  ;;  %v1047_v59 = vld [vmem:[%s4016_s7 + $0x130] sm:$0xff] }
 0x160   :  { %v993_v30 = vmul.f32 %v2753_v40, %v985_v12  ;;  %v3502_v15 = vsel %vm798_vm1, 0.0, %v2761_v31  ;;  %v987_v0 = vsub.f32 2.0, %v979_v28  ;;  %v2660_v21 = vpack.c.bf16 %v1056_v42, %v1048_v39  ;;  %v1070_v28 = vld [vmem:[%s4016_s7 + $0x1e8] sm:$0xff]  ;;  %v1064_v52 = vld [vmem:[%s4016_s7 + $0x1b8] sm:$0xff] }
 0x161   :  { %v939_v17 = vsel %vm808_vm10, %v3502_v15, 0.0  ;;  %v994_v53 = vmul.f32 %v2755_v14, %v986_v5  ;;  %v988_v43 = vsub.f32 2.0, %v980_v13  ;;  %vm960_vm2 = vcmp.eq.f32.partialorder %v952_v22, 0.0  ;;  %v1063_v13 = vld [vmem:[%s4016_s7 + $0x1b0] sm:$0xff] }
 0x162   :  { %v3520_v6 = vmul.f32 %v993_v30, %v3439_v8  ;;  %v3531_v33 = vpop.eup %2762  ;;  %v1046_v8 = vld [vmem:[%s4016_s7 + $0x128] sm:$0xff]  ;;  %v940_v16 = vrot.slane %v939_v17, 4  ;;  %v995_v44 = vmul.f32 %v2757_v58, %v987_v0  ;;  %v1053_v58 = vld [vmem:[%s4016_s7 + $0x160] sm:$0xff]  ;;  %v3588_v31 = vsel %vm960_vm2, 1.0, %v952_v22  ;;  %v1071_v0 = vld [vmem:[%s4016_s7 + $0x1f0] sm:$0xff] }
 0x163   :  { %v3552_v40 = vpop.eup %2764  ;;  %v3555_v56 = vmul.f32 %v994_v53, %v3443_v24  ;;  %v981_v14 = vmul.f32 %v3531_v33, %v965_v45  ;;  %v1055_v24 = vld [vmem:[%s4016_s7 + $0x170] sm:$0xff]  ;;  %v2644_v45 = vpack.c.bf16 %v1054_v35, %v1046_v8  ;;  %v2646_v5 = vpack.c.bf16 %v1053_v58, %v1045_v47  ;;  %v1061_v30 = vld [vmem:[%s4016_s7 + $0x1a0] sm:$0xff]  ;;  %v1552_v53 = vld [vmem:[#allocation2 + $0x18] sm:$0xff]  ;;  %s2823_s7 = smov [#allocation5]  }
 0x164   :  { %2296 = vmatmul.mubr.msk.f32.vlgmr.msra.gmra.mrb[10].mxu1 %vm808_vm10, %v3520_v6  ;;  %2304 = vmatmul.mubr.msk.f32.vlgmr.msra.gmra.mrb[18].mxu0 %vm808_vm10, %v3520_v6  ;;  %v941_v57 = vadd.f32 %v940_v16, %v939_v17  ;;  %v982_v3 = vmul.f32 %v3552_v40, %v3480_v49  ;;  %v2662_v55 = vpack.c.bf16 %v1055_v24, %v1047_v59  ;;  %v1550_v17 = vld [vmem:[#allocation2 + $0x8] sm:$0xff]  ;;  %v1560_v22 = vld [vmem:[#allocation2 + $0x58] sm:$0xff]  ;;  %2766 = vrcp.f32 %v3588_v31  ;;  %v1557_v59 = vld [vmem:[#allocation2 + $0x40] sm:$0xff]  ;;  %s2255_s23 = sshll.u32 %s2823_s7, 4  ;;  %s2256_s23 = int_to_ptr.vmem [resolvable:$true] %s2255_s23 }
 0x165   :  { %2639 = vmatpush1.bf16.msra.mxu1 %v2638_v25  ;;  %2655 = vmatpush1.bf16.msra.mxu0 %v2654_v19  ;;  %v996_v25 = vmul.f32 %v3489_v1, %v988_v43  ;;  %v3597_v60 = vmul.f32 %v995_v44, %v3451_v37  ;;  %v989_v50 = vsub.f32 2.0, %v981_v14  ;;  %v2648_v37 = vpack.c.bf16 %v1070_v28, %v1062_v63  ;;  %v1551_v24 = vld [vmem:[#allocation2 + $0x10] sm:$0xff]  ;;  %v1568_v63 = vld [vmem:[#allocation2 + $0x98] sm:$0xff]  ;;  %s2792_s24 = scalar_lea.vmem %s2256_s23, 1024  ;;  %p2797_p9 = scmp.lt.s32.totalorder %s2256_s23, %s2256_s23 }
 0x166   :  { %1167 = vmatprep.mubr.f32.mxu1 %v2821_v62  ;;  %1280 = vmatprep.mubr.f32.mxu0 %v2821_v62  ;;  %v942_v12 = vrot.slane %v941_v57, 2  ;;  %v2664_v1 = vpack.c.bf16 %v1072_v2, %v1064_v52  ;;  %v2650_v27 = vpack.c.bf16 %v1069_v18, %v1061_v30  ;;  %v2666_v29 = vpack.c.bf16 %v1071_v0, %v1063_v13  ;;  %v1565_v52 = vld [vmem:[#allocation2 + $0x80] sm:$0xff]  ;;  %v1582_v30 = vld [vmem:[#allocation2 + $0x108] sm:$0xff]  ;;  %p2793_p8 = scmp.ne.s32.totalorder %s2256_s23, %s2792_s24  ;;  %p2798_p10 = scmp.lt.s32.totalorder %s2792_s24, %s2792_s24 }
 0x167   :  { %2641 = vmatprep.subr.bf16.mxu1 %v2640_v34  ;;  %2657 = vmatprep.subr.bf16.mxu0 %v2656_v36  ;;  %v3616_v32 = vmul.f32 %v996_v25, %v3455_v38  ;;  %v990_v34 = vsub.f32 2.0, %v982_v3  ;;  %v997_v36 = vmul.f32 %v3531_v33, %v989_v50  ;;  %v2668_v16 = vpack.c.bf16 %v1558_v20, %v1550_v17  ;;  %v1573_v2 = vld [vmem:[#allocation2 + $0xc0] sm:$0xff]  ;;  %v1590_v25 = vld [vmem:[#allocation2 + $0x148] sm:$0xff]  ;;  %v1584_v50 = vld [vmem:[#allocation2 + $0x118] sm:$0xff] }
 0x168   :  { %2297 = vmatmul.mubr.msk.f32.gmra.mrb[12].mxu1 %vm808_vm10, %v3555_v56  ;;  %2305 = vmatmul.mubr.msk.f32.gmra.mrb[20].mxu0 %vm808_vm10, %v3555_v56  ;;  %v943_v49 = vadd.f32 %v942_v12, %v941_v57  ;;  %v2684_v35 = vpack.c.bf16 %v1560_v22, %v1552_v53  ;;  %v1549_v57 = vld [vmem:[#allocation2] sm:$0xff]  ;;  %v1576_v12 = vld [vmem:[#allocation2 + $0xd8] sm:$0xff]  ;;  %v2674_v18 = vpack.c.bf16 %v1573_v2, %v1565_v52  ;;  %v1591_v20 = vld [vmem:[#allocation2 + $0x150] sm:$0xff]  ;;  %p2799_p11 = por %p2798_p10, %p2797_p9 }
 0x169   :  { %1173 = vmatprep.mubr.f32.mxu1 %v2821_v62  ;;  %1286 = vmatprep.mubr.f32.mxu0 %v2821_v62  ;;  %v998_v38 = vmul.f32 %v3552_v40, %v990_v34  ;;  %v3627_v33 = vmul.f32 %v997_v36, %v3469_v61  ;;  %v2670_v28 = vpack.c.bf16 %v1557_v59, %v1549_v57  ;;  %v1581_v0 = vld [vmem:[#allocation2 + $0x100] sm:$0xff]  ;;  %v1606_v53 = vld [vmem:[#allocation2 + $0x1c8] sm:$0xff]  ;;  %v1600_v22 = vld [vmem:[#allocation2 + $0x198] sm:$0xff] }
 0x16a   :  { %2643 = vmatpush1.bf16.msra.mxu1 %v2642_v46  ;;  %2659 = vmatpush1.bf16.msra.mxu0 %v2658_v48  ;;  %v944_v19 = vrot.slane %v943_v49, 1  ;;  %v1597_v36 = vld [vmem:[#allocation2 + $0x180] sm:$0xff]  ;;  %v1570_v57 = vld [vmem:[#allocation2 + $0xa8] sm:$0xff]  ;;  %v1572_v59 = vld [vmem:[#allocation2 + $0xb8] sm:$0xff]  ;;  %p2800_p12 = pnand %p2799_p11, %p2793_p8 }
 0x16b   :  { %2645 = vmatprep.subr.bf16.mxu1 %v2644_v45  ;;  %2661 = vmatprep.subr.bf16.mxu0 %v2660_v21  ;;  %v3636_v42 = vmul.f32 %v998_v38, %v3463_v41  ;;  %v1559_v45 = vld [vmem:[#allocation2 + $0x50] sm:$0xff]  ;;  %v1566_v21 = vld [vmem:[#allocation2 + $0x88] sm:$0xff]  ;;  %v1588_v2 = vld [vmem:[#allocation2 + $0x138] sm:$0xff] }
 0x16c   :  { %2298 = vmatmul.mubr.msk.f32.gmra.mrb[14].mxu1 %vm808_vm10, %v3597_v60  ;;  %2306 = vmatmul.mubr.msk.f32.gmra.mrb[22].mxu0 %vm808_vm10, %v3597_v60  ;;  %v945_v8 = vadd.f32 %v944_v19, %v943_v49  ;;  %v1592_v49 = vld [vmem:[#allocation2 + $0x158] sm:$0xff]  ;;  %v1583_v19 = vld [vmem:[#allocation2 + $0x110] sm:$0xff]  ;;  %v1586_v52 = vld [vmem:[#allocation2 + $0x128] sm:$0xff] }
 0x16d   :  { %1179 = vmatprep.mubr.f32.mxu1 %v2821_v62  ;;  %1292 = vmatprep.mubr.f32.mxu0 %v2821_v62  ;;  %v2692_v17 = vpack.c.bf16 %v1592_v49, %v1584_v50  ;;  %v2694_v34 = vpack.c.bf16 %v1591_v20, %v1583_v19  ;;  %v1607_v38 = vld [vmem:[#allocation2 + $0x1d0] sm:$0xff]  ;;  %v1601_v20 = vld [vmem:[#allocation2 + $0x1a0] sm:$0xff] }
 0x16e   :  { %2647 = vmatpush1.bf16.msra.mxu1 %v2646_v5  ;;  %2663 = vmatpush1.bf16.msra.mxu0 %v2662_v55  ;;  %vm959_vm3 = vcmp.eq.f32.partialorder %v945_v8, 0.0  ;;  %v2767_v61 = vpop.eup %2766  ;;  %v1567_v5 = vld [vmem:[#allocation2 + $0x90] sm:$0xff] }
 0x16f   :  { %2649 = vmatprep.subr.bf16.mxu1 %v2648_v37  ;;  %2665 = vmatprep.subr.bf16.mxu0 %v2664_v1  ;;  %v967_v39 = vsel %vm959_vm3, 1.0, %v945_v8  ;;  %v984_v43 = vmul.f32 %v2767_v61, %v3588_v31  ;;  %v2688_v31 = vpack.c.bf16 %v1576_v12, %v1568_v63  ;;  %v1575_v55 = vld [vmem:[#allocation2 + $0xd0] sm:$0xff]  ;;  %v1589_v37 = vld [vmem:[#allocation2 + $0x140] sm:$0xff]  ;;  %v2676_v1 = vpack.c.bf16 %v1590_v25, %v1582_v30 }
 0x170   :  { %2299 = vmatmul.mubr.msk.f32.gmra.mrb[16].mxu1 %vm808_vm10, %v3616_v32  ;;  %2307 = vmatmul.mubr.msk.f32.gmra.mrb[24].mxu0 %vm808_vm10, %v3616_v32  ;;  %2768 = vrcp.f32 %v967_v39  ;;  %v2690_v13 = vpack.c.bf16 %v1575_v55, %v1567_v5  ;;  %v1605_v8 = vld [vmem:[#allocation2 + $0x1c0] sm:$0xff]  ;;  %v1587_v49 = vld [vmem:[#allocation2 + $0x130] sm:$0xff] }
 0x171   :  { %1185 = vmatprep.mubr.f32.mxu1 %v2821_v62  ;;  %1298 = vmatprep.mubr.f32.mxu0 %v2821_v62  ;;  %v992_v48 = vsub.f32 2.0, %v984_v43  ;;  %v1556_v43 = vld [vmem:[#allocation2 + $0x38] sm:$0xff]  ;;  %v1585_v55 = vld [vmem:[#allocation2 + $0x120] sm:$0xff] }
 0x172   :  { %2651 = vmatpush1.bf16.msra.mxu1 %v2650_v27  ;;  %2667 = vmatpush1.bf16.msra.mxu0 %v2666_v29  ;;  %v1608_v27 = vld [vmem:[#allocation2 + $0x1d8] sm:$0xff]  ;;  %v2678_v29 = vpack.c.bf16 %v1589_v37, %v1581_v0  ;;  %v1593_v30 = vld [vmem:[#allocation2 + $0x160] sm:$0xff]  ;;  %v1610_v0 = vld [vmem:[#allocation2 + $0x1e8] sm:$0xff] }
 0x173   :  { %2669 = vmatprep.subr.bf16.mxu1 %v2668_v16  ;;  %2685 = vmatprep.subr.bf16.mxu0 %v2684_v35  ;;  %v1000_v41 = vmul.f32 %v2767_v61, %v992_v48  ;;  %v2696_v35 = vpack.c.bf16 %v1608_v27, %v1600_v22  ;;  %v1562_v61 = vld [vmem:[#allocation2 + $0x68] sm:$0xff]  ;;  %v1604_v37 = vld [vmem:[#allocation2 + $0x1b8] sm:$0xff]  ;;  %v1609_v22 = vld [vmem:[#allocation2 + $0x1e0] sm:$0xff] }
 0x174   :  { %2300 = vmatmul.mubr.msk.f32.gmra.mrb[18].mxu1 %vm808_vm10, %v3627_v33  ;;  %2308 = vmatmul.mubr.msk.f32.gmra.mrb[26].mxu0 %vm808_vm10, %v3627_v33  ;;  %v1603_v27 = vld [vmem:[#allocation2 + $0x1b0] sm:$0xff] }
 0x175   :  { %1191 = vmatprep.mubr.f32.mxu1 %v2821_v62  ;;  %1304 = vmatprep.mubr.f32.mxu0 %v2821_v62  ;;  %v3655_v58 = vmul.f32 %v1000_v41, %v3476_v10  ;;  %v2686_v10 = vpack.c.bf16 %v1559_v45, %v1551_v24  ;;  %v1563_v41 = vld [vmem:[#allocation2 + $0x70] sm:$0xff]  ;;  %v1580_v24 = vld [vmem:[#allocation2 + $0xf8] sm:$0xff] }
 0x176   :  { %v2720_v12 = vpack.c.bf16 %v1580_v24, %v1572_v59 }
 0x178   :  { %2301 = vmatmul.mubr.msk.f32.gmra.mrb[20].mxu1 %vm808_vm10, %v3636_v42  ;;  %2309 = vmatmul.mubr.msk.f32.gmra.mrb[28].mxu0 %vm808_vm10, %v3636_v42 }
 0x179   :  { %1197 = vmatprep.mubr.f32.mxu1 %v2821_v62  ;;  %1310 = vmatprep.mubr.f32.mxu0 %v2821_v62 }
 0x17a   :  { %v2769_v44 = vpop.eup %2768 }
 0x17b   :  { %v983_v46 = vmul.f32 %v2769_v44, %v967_v39  ;;  %v1599_v39 = vld [vmem:[#allocation2 + $0x190] sm:$0xff] }
 0x17c   :  { %v2698_v48 = vpack.c.bf16 %v1607_v38, %v1599_v39 }
 0x17d   :  { %v991_v47 = vsub.f32 2.0, %v983_v46  ;;  %v2682_v46 = vpack.c.bf16 %v1605_v8, %v1597_v36 }
 0x17f   :  { %v999_v40 = vmul.f32 %v2769_v44, %v991_v47  ;;  %v1564_v44 = vld [vmem:[#allocation2 + $0x78] sm:$0xff] }
 0x181   :  { %v3646_v14 = vmul.f32 %v999_v40, %v3502_v15  ;;  %v1574_v15 = vld [vmem:[#allocation2 + $0xc8] sm:$0xff]  ;;  %v2716_v40 = vpack.c.bf16 %v1564_v44, %v1556_v43 }
 0x182   :  { %v2672_v3 = vpack.c.bf16 %v1574_v15, %v1566_v21  ;;  %v1569_v21 = vld [vmem:[#allocation2 + $0xa0] sm:$0xff] }
 0x183   :  { %2302 = vmatmul.mubr.msk.f32.gmra.mrb[22].mxu1 %vm808_vm10, %v3646_v14  ;;  %2310 = vmatmul.mubr.msk.f32.gmra.mrb[30].mxu0 %vm808_vm10, %v3646_v14  ;;  %v1577_v15 = vld [vmem:[#allocation2 + $0xe0] sm:$0xff] }
 0x184   :  { %1203 = vmatprep.mubr.f32.mxu1 %v2821_v62  ;;  %1316 = vmatprep.mubr.f32.mxu0 %v2821_v62 }
 0x187   :  { %2303 = vmatmul.mubr.msk.f32.gmra.mrb[24].mxu1 %vm808_vm10, %v3655_v58  ;;  %2311 = vmatmul.mubr.msk.f32.gmra.mrb[32].mxu0 %vm808_vm10, %v3655_v58 }
 0x188   :  { %1387 = vmatprep.mubr.f32.mxu1 %v2821_v62  ;;  %1500 = vmatprep.mubr.f32.mxu0 %v2821_v62 }
 0x18b   :  { %2312 = vmatmul.mubr.msk.f32.vlgmr.msra.gmra.mrb[26].mxu1 %vm808_vm10, %v3520_v6  ;;  %2320 = vmatmul.mubr.msk.f32.vlgmr.msra.gmra.mrb[34].mxu0 %vm808_vm10, %v3520_v6  ;;  %v1598_v6 = vld [vmem:[#allocation2 + $0x188] sm:$0xff] }
 0x18c   :  { %2671 = vmatpush1.bf16.msra.mxu1 %v2670_v28  ;;  %2687 = vmatpush1.bf16.msra.mxu0 %v2686_v10  ;;  %v2680_v16 = vpack.c.bf16 %v1606_v53, %v1598_v6  ;;  %v1571_v28 = vld [vmem:[#allocation2 + $0xb0] sm:$0xff] }
 0x18d   :  { %1393 = vmatprep.mubr.f32.mxu1 %v2821_v62  ;;  %1506 = vmatprep.mubr.f32.mxu0 %v2821_v62  ;;  %v1579_v10 = vld [vmem:[#allocation2 + $0xf0] sm:$0xff] }
 0x18e   :  { %2673 = vmatprep.subr.bf16.mxu1 %v2672_v3  ;;  %2689 = vmatprep.subr.bf16.mxu0 %v2688_v31  ;;  %v1596_v3 = vld [vmem:[#allocation2 + $0x178] sm:$0xff]  ;;  %v2706_v31 = vpack.c.bf16 %v1577_v15, %v1569_v21  ;;  %v2722_v5 = vpack.c.bf16 %v1579_v10, %v1571_v28 }
 0x18f   :  { %2313 = vmatmul.mubr.msk.f32.gmra.mrb[28].mxu1 %vm808_vm10, %v3555_v56  ;;  %2321 = vmatmul.mubr.msk.f32.gmra.mrb[36].mxu0 %vm808_vm10, %v3555_v56  ;;  %v1554_v56 = vld [vmem:[#allocation2 + $0x28] sm:$0xff]  ;;  %v2724_v50 = vpack.c.bf16 %v1596_v3, %v1588_v2 }
 0x190   :  { %1399 = vmatprep.mubr.f32.mxu1 %v2821_v62  ;;  %1512 = vmatprep.mubr.f32.mxu0 %v2821_v62  ;;  %v2700_v47 = vpack.c.bf16 %v1562_v61, %v1554_v56 }
 0x191   :  { %2675 = vmatpush1.bf16.msra.mxu1 %v2674_v18  ;;  %2691 = vmatpush1.bf16.msra.mxu0 %v2690_v13  ;;  %v1595_v18 = vld [vmem:[#allocation2 + $0x170] sm:$0xff]  ;;  %v1602_v13 = vld [vmem:[#allocation2 + $0x1a8] sm:$0xff] }
 0x192   :  { %2677 = vmatprep.subr.bf16.mxu1 %v2676_v1  ;;  %2693 = vmatprep.subr.bf16.mxu0 %v2692_v17  ;;  %v1612_v1 = vld [vmem:[#allocation2 + $0x1f8] sm:$0xff]  ;;  %v2710_v17 = vpack.c.bf16 %v1593_v30, %v1585_v55  ;;  %v2726_v19 = vpack.c.bf16 %v1595_v18, %v1587_v49  ;;  %v2712_v6 = vpack.c.bf16 %v1610_v0, %v1602_v13 }
 0x193   :  { %2314 = vmatmul.mubr.msk.f32.gmra.mrb[30].mxu1 %vm808_vm10, %v3597_v60  ;;  %2322 = vmatmul.mubr.msk.f32.gmra.mrb[38].mxu0 %vm808_vm10, %v3597_v60  ;;  %v1553_v60 = vld [vmem:[#allocation2 + $0x20] sm:$0xff]  ;;  %v2728_v53 = vpack.c.bf16 %v1612_v1, %v1604_v37 }
 0x194   :  { %1405 = vmatprep.mubr.f32.mxu1 %v2821_v62  ;;  %1518 = vmatprep.mubr.f32.mxu0 %v2821_v62 }
 0x195   :  { %2679 = vmatpush1.bf16.msra.mxu1 %v2678_v29  ;;  %2695 = vmatpush1.bf16.msra.mxu0 %v2694_v34  ;;  %v1611_v29 = vld [vmem:[#allocation2 + $0x1f0] sm:$0xff]  ;;  %v2714_v34 = vpack.c.bf16 %v1609_v22, %v1601_v20 }
 0x196   :  { %2681 = vmatprep.subr.bf16.mxu1 %v2680_v16  ;;  %2697 = vmatprep.subr.bf16.mxu0 %v2696_v35  ;;  %v2730_v36 = vpack.c.bf16 %v1611_v29, %v1603_v27 }
 0x197   :  { %2315 = vmatmul.mubr.msk.f32.gmra.mrb[32].mxu1 %vm808_vm10, %v3616_v32  ;;  %2323 = vmatmul.mubr.msk.f32.gmra.mrb[40].mxu0 %vm808_vm10, %v3616_v32  ;;  %v1561_v32 = vld [vmem:[#allocation2 + $0x60] sm:$0xff] }
 0x198   :  { %1411 = vmatprep.mubr.f32.mxu1 %v2821_v62  ;;  %1524 = vmatprep.mubr.f32.mxu0 %v2821_v62 }
 0x199   :  { %2683 = vmatpush1.bf16.msra.mxu1 %v2682_v46  ;;  %2699 = vmatpush1.bf16.msra.mxu0 %v2698_v48 }
 0x19a   :  { %2701 = vmatprep.subr.bf16.mxu1 %v2700_v47  ;;  %2717 = vmatprep.subr.bf16.mxu0 %v2716_v40 }
 0x19b   :  { %2316 = vmatmul.mubr.msk.f32.gmra.mrb[34].mxu1 %vm808_vm10, %v3627_v33  ;;  %2324 = vmatmul.mubr.msk.f32.gmra.mrb[42].mxu0 %vm808_vm10, %v3627_v33  ;;  %v1555_v33 = vld [vmem:[#allocation2 + $0x30] sm:$0xff] }
 0x19c   :  { %1417 = vmatprep.mubr.f32.mxu1 %v2821_v62  ;;  %1530 = vmatprep.mubr.f32.mxu0 %v2821_v62  ;;  %v2718_v45 = vpack.c.bf16 %v1563_v41, %v1555_v33 }
 0x19f   :  { %2317 = vmatmul.mubr.msk.f32.gmra.mrb[36].mxu1 %vm808_vm10, %v3636_v42  ;;  %2325 = vmatmul.mubr.msk.f32.gmra.mrb[44].mxu0 %vm808_vm10, %v3636_v42  ;;  %v1578_v42 = vld [vmem:[#allocation2 + $0xe8] sm:$0xff] }
 0x1a0   :  { %1423 = vmatprep.mubr.f32.mxu1 %v2821_v62  ;;  %1536 = vmatprep.mubr.f32.mxu0 %v2821_v62  ;;  %v2704_v63 = vpack.c.bf16 %v1578_v42, %v1570_v57 }
 0x1a3   :  { %2318 = vmatmul.mubr.msk.f32.gmra.mrb[38].mxu1 %vm808_vm10, %v3646_v14  ;;  %2326 = vmatmul.mubr.msk.f32.gmra.mrb[46].mxu0 %vm808_vm10, %v3646_v14  ;;  %v2702_v14 = vpack.c.bf16 %v1561_v32, %v1553_v60 }
 0x1a4   :  { %1429 = vmatprep.mubr.f32.mxu1 %v2821_v62  ;;  %1542 = vmatprep.mubr.f32.mxu0 %v2821_v62 }
 0x1a7   :  { %2319 = vmatmul.mubr.msk.f32.gmra.mrb[40].mxu1 %vm808_vm10, %v3655_v58  ;;  %2327 = vmatmul.mubr.msk.f32.gmra.mrb[48].mxu0 %vm808_vm10, %v3655_v58  ;;  %v1594_v58 = vld [vmem:[#allocation2 + $0x168] sm:$0xff] }
 0x1a8   :  { %1701 = vmatprep.mubr.f32.mxu1 %v2821_v62  ;;  %1814 = vmatprep.mubr.f32.mxu0 %v2821_v62  ;;  %v2708_v25 = vpack.c.bf16 %v1594_v58, %v1586_v52 }
 0x1ab   :  { %2328 = vmatmul.mubr.msk.f32.vlgmr.msra.gmra.mrb[42].mxu1 %vm808_vm10, %v3230_v26  ;;  %2336 = vmatmul.mubr.msk.f32.vlgmr.msra.gmra.mrb[50].mxu0 %vm808_vm10, %v3230_v26 }
 0x1ac   :  { %2703 = vmatpush1.bf16.msra.mxu1 %v2702_v14  ;;  %2719 = vmatpush1.bf16.msra.mxu0 %v2718_v45 }
 0x1ad   :  { %1707 = vmatprep.mubr.f32.mxu1 %v2821_v62  ;;  %1820 = vmatprep.mubr.f32.mxu0 %v2821_v62 }
 0x1ae   :  { %2705 = vmatprep.subr.bf16.mxu1 %v2704_v63  ;;  %2721 = vmatprep.subr.bf16.mxu0 %v2720_v12 }
 0x1af   :  { %2329 = vmatmul.mubr.msk.f32.gmra.mrb[44].mxu1 %vm808_vm10, %v3226_v23  ;;  %2337 = vmatmul.mubr.msk.f32.gmra.mrb[52].mxu0 %vm808_vm10, %v3226_v23 }
 0x1b0   :  { %1713 = vmatprep.mubr.f32.mxu1 %v2821_v62  ;;  %1826 = vmatprep.mubr.f32.mxu0 %v2821_v62 }
 0x1b1   :  { %2707 = vmatpush1.bf16.msra.mxu1 %v2706_v31  ;;  %2723 = vmatpush1.bf16.msra.mxu0 %v2722_v5 }
 0x1b2   :  { %2709 = vmatprep.subr.bf16.mxu1 %v2708_v25  ;;  %2725 = vmatprep.subr.bf16.mxu0 %v2724_v50 }
 0x1b3   :  { %2330 = vmatmul.mubr.msk.f32.gmra.mrb[46].mxu1 %vm808_vm10, %v3286_v54  ;;  %2338 = vmatmul.mubr.msk.f32.gmra.mrb[54].mxu0 %vm808_vm10, %v3286_v54 }
 0x1b4   :  { %1719 = vmatprep.mubr.f32.mxu1 %v2821_v62  ;;  %1832 = vmatprep.mubr.f32.mxu0 %v2821_v62 }
 0x1b5   :  { %2711 = vmatpush1.bf16.msra.mxu1 %v2710_v17  ;;  %2727 = vmatpush1.bf16.msra.mxu0 %v2726_v19 }
 0x1b6   :  { %2713 = vmatprep.subr.bf16.mxu1 %v2712_v6  ;;  %2729 = vmatprep.subr.bf16.mxu0 %v2728_v53 }
 0x1b7   :  { %2331 = vmatmul.mubr.msk.f32.gmra.mrb[48].mxu1 %vm808_vm10, %v3282_v51  ;;  %2339 = vmatmul.mubr.msk.f32.gmra.mrb[56].mxu0 %vm808_vm10, %v3282_v51 }
 0x1b8   :  { %1725 = vmatprep.mubr.f32.mxu1 %v2821_v62  ;;  %1838 = vmatprep.mubr.f32.mxu0 %v2821_v62 }
 0x1b9   :  { %2715 = vmatpush1.bf16.msra.mxu1 %v2714_v34  ;;  %2731 = vmatpush1.bf16.msra.mxu0 %v2730_v36 }
 0x1bb   :  { %2332 = vmatmul.mubr.msk.f32.gmra.mrb[50].mxu1 %vm808_vm10, %v3318_v7  ;;  %2340 = vmatmul.mubr.msk.f32.gmra.mrb[58].mxu0 %vm808_vm10, %v3318_v7 }
 0x1bc   :  { %1731 = vmatprep.mubr.f32.mxu1 %v2821_v62  ;;  %1844 = vmatprep.mubr.f32.mxu0 %v2821_v62 }
 0x1bf   :  { %2333 = vmatmul.mubr.msk.f32.gmra.mrb[52].mxu1 %vm808_vm10, %v3314_v4  ;;  %2341 = vmatmul.mubr.msk.f32.gmra.mrb[60].mxu0 %vm808_vm10, %v3314_v4 }
 0x1c0   :  { %1737 = vmatprep.mubr.f32.mxu1 %v2821_v62  ;;  %1850 = vmatprep.mubr.f32.mxu0 %v2821_v62 }
 0x1c3   :  { %2334 = vmatmul.mubr.msk.f32.gmra.mrb[54].mxu1 %vm808_vm10, %v3326_v11  ;;  %2342 = vmatmul.mubr.msk.f32.gmra.mrb[62].mxu0 %vm808_vm10, %v3326_v11 }
 0x1c4   :  { %1743 = vmatprep.mubr.f32.mxu1 %v2821_v62  ;;  %1856 = vmatprep.mubr.f32.mxu0 %v2821_v62 }
 0x1c7   :  { %2335 = vmatmul.mubr.msk.f32.gmra.mrb[56].mxu1 %vm808_vm10, %v3322_v9  ;;  %2343 = vmatmul.mubr.msk.f32.gmra.mrb[64].mxu0 %vm808_vm10, %v3322_v9 }
 0x1c8   :  { %1927 = vmatprep.mubr.f32.mxu1 %v2821_v62  ;;  %2040 = vmatprep.mubr.f32.mxu0 %v2821_v62 }
 0x1cb   :  { %2344 = vmatmul.mubr.msk.f32.vlgmr.msra.gmra.mrb[58].mxu1 %vm808_vm10, %v3230_v26  ;;  %2352 = vmatmul.mubr.msk.f32.vlgmr.msra.gmra.mrb[66].mxu0 %vm808_vm10, %v3230_v26 }
 0x1cc   :  { %1933 = vmatprep.mubr.f32.mxu1 %v2821_v62  ;;  %2046 = vmatprep.mubr.f32.mxu0 %v2821_v62 }
 0x1cf   :  { %2345 = vmatmul.mubr.msk.f32.gmra.mrb[60].mxu1 %vm808_vm10, %v3226_v23  ;;  %2353 = vmatmul.mubr.msk.f32.gmra.mrb[68].mxu0 %vm808_vm10, %v3226_v23 }
 0x1d0   :  { %1939 = vmatprep.mubr.f32.mxu1 %v2821_v62  ;;  %2052 = vmatprep.mubr.f32.mxu0 %v2821_v62 }
 0x1d3   :  { %2346 = vmatmul.mubr.msk.f32.gmra.mrb[62].mxu1 %vm808_vm10, %v3286_v54  ;;  %2354 = vmatmul.mubr.msk.f32.gmra.mrb[70].mxu0 %vm808_vm10, %v3286_v54 }
 0x1d4   :  { %1945 = vmatprep.mubr.f32.mxu1 %v2821_v62  ;;  %2058 = vmatprep.mubr.f32.mxu0 %v2821_v62 }
 0x1d7   :  { %2347 = vmatmul.mubr.msk.f32.gmra.mrb[64].mxu1 %vm808_vm10, %v3282_v51  ;;  %2355 = vmatmul.mubr.msk.f32.gmra.mrb[72].mxu0 %vm808_vm10, %v3282_v51 }
 0x1d8   :  { %1951 = vmatprep.mubr.f32.mxu1 %v2821_v62  ;;  %2064 = vmatprep.mubr.f32.mxu0 %v2821_v62 }
 0x1db   :  { %2348 = vmatmul.mubr.msk.f32.gmra.mrb[66].mxu1 %vm808_vm10, %v3318_v7  ;;  %2356 = vmatmul.mubr.msk.f32.gmra.mrb[74].mxu0 %vm808_vm10, %v3318_v7 }
 0x1dc   :  { %1957 = vmatprep.mubr.f32.mxu1 %v2821_v62  ;;  %2070 = vmatprep.mubr.f32.mxu0 %v2821_v62 }
 0x1df   :  { %2349 = vmatmul.mubr.msk.f32.gmra.mrb[68].mxu1 %vm808_vm10, %v3314_v4  ;;  %2357 = vmatmul.mubr.msk.f32.gmra.mrb[76].mxu0 %vm808_vm10, %v3314_v4 }
 0x1e0   :  { %1963 = vmatprep.mubr.f32.mxu1 %v2821_v62  ;;  %2076 = vmatprep.mubr.f32.mxu0 %v2821_v62 }
 0x1e3   :  { %2350 = vmatmul.mubr.msk.f32.gmra.mrb[70].mxu1 %vm808_vm10, %v3326_v11  ;;  %2358 = vmatmul.mubr.msk.f32.gmra.mrb[78].mxu0 %vm808_vm10, %v3326_v11 }
 0x1e4   :  { %1969 = vmatprep.mubr.f32.mxu1 %v2821_v62  ;;  %2082 = vmatprep.mubr.f32.mxu0 %v2821_v62 }
 0x1e7   :  { %2351 = vmatmul.mubr.msk.f32.gmra.mrb[72].mxu1 %vm808_vm10, %v3322_v9  ;;  %2359 = vmatmul.mubr.msk.f32.gmra.mrb[80].mxu0 %vm808_vm10, %v3322_v9 }
 0x237   :  { %v3805_v23 = vpop.f32.mrb[10].mxu1  ;;  %v3807_v26 = vpop.f32.mrb[18].mxu0 }
 0x238   :  { %v3809_v51 = vpop.f32.mrb[11].mxu1  ;;  %v3811_v54 = vpop.f32.mrb[19].mxu0 }
 0x23b   :  { %v3813_v4 = vpop.f32.mrb[12].mxu1  ;;  %v3815_v7 = vpop.f32.mrb[20].mxu0 }
 0x23c   :  { %v3817_v11 = vpop.f32.mrb[13].mxu1  ;;  %v3819_v62 = vpop.f32.mrb[21].mxu0 }
 0x23f   :  { %v3821_v8 = vpop.f32.mrb[14].mxu1  ;;  %v3823_v16 = vpop.f32.mrb[22].mxu0 }
 0x240   :  { %v3825_v9 = vpop.f32.mrb[15].mxu1  ;;  %v3827_v35 = vpop.f32.mrb[23].mxu0 }
 0x243   :  { %v3829_v39 = vpop.f32.mrb[16].mxu1  ;;  %v3831_v38 = vpop.f32.mrb[24].mxu0 }
 0x244   :  { %v3833_v56 = vpop.f32.mrb[17].mxu1  ;;  %v3835_v61 = vpop.f32.mrb[25].mxu0 }
 0x247   :  { %v3837_v43 = vpop.f32.mrb[18].mxu1  ;;  %v3839_v44 = vpop.f32.mrb[26].mxu0 }
 0x248   :  { %v3841_v46 = vpop.f32.mrb[19].mxu1  ;;  %v3843_v48 = vpop.f32.mrb[27].mxu0 }
 0x24b   :  { %v3845_v47 = vpop.f32.mrb[20].mxu1  ;;  %v3847_v40 = vpop.f32.mrb[28].mxu0 }
 0x24c   :  { %v3849_v60 = vpop.f32.mrb[21].mxu1  ;;  %v3851_v32 = vpop.f32.mrb[29].mxu0 }
 0x256   :  { %v3853_v33 = vpop.f32.mrb[22].mxu1  ;;  %v3855_v41 = vpop.f32.mrb[30].mxu0 }
 0x257   :  { %v3857_v57 = vpop.f32.mrb[23].mxu1  ;;  %v3859_v42 = vpop.f32.mrb[31].mxu0 }
 0x25a   :  { %v3861_v59 = vpop.f32.mrb[24].mxu1  ;;  %v3863_v24 = vpop.f32.mrb[32].mxu0 }
 0x25b   :  { %v3865_v14 = vpop.f32.mrb[25].mxu1  ;;  %v3867_v45 = vpop.f32.mrb[33].mxu0 }
 0x25e   :  { %v3869_v21 = vpop.f32.mrb[26].mxu1  ;;  %v3871_v15 = vpop.f32.mrb[34].mxu0 }
 0x25f   :  { %v3873_v63 = vpop.f32.mrb[27].mxu1  ;;  %v3875_v12 = vpop.f32.mrb[35].mxu0 }
 0x262   :  { %v3877_v28 = vpop.f32.mrb[28].mxu1  ;;  %v3879_v10 = vpop.f32.mrb[36].mxu0 }
 0x263   :  { %v3881_v52 = vpop.f32.mrb[29].mxu1  ;;  %v3883_v58 = vpop.f32.mrb[37].mxu0 }
 0x266   :  { %v3885_v2 = vpop.f32.mrb[30].mxu1  ;;  %v3887_v3 = vpop.f32.mrb[38].mxu0 }
 0x267   :  { %v3889_v31 = vpop.f32.mrb[31].mxu1  ;;  %v3891_v5 = vpop.f32.mrb[39].mxu0 }
 0x26a   :  { %v3893_v55 = vpop.f32.mrb[32].mxu1  ;;  %v3895_v30 = vpop.f32.mrb[40].mxu0 }
 0x26b   :  { %v3897_v25 = vpop.f32.mrb[33].mxu1  ;;  %v3899_v50 = vpop.f32.mrb[41].mxu0 }
 0x26c   :  { %4019 = vst [vmem:[#allocation8_spill] sm:$0xff] %v3899_v50 }
 0x26e   :  { %v3901_v49 = vpop.f32.mrb[34].mxu1  ;;  %v3903_v18 = vpop.f32.mrb[42].mxu0 }
 0x26f   :  { %4020 = vst [vmem:[#allocation9_spill] sm:$0xff] %v3901_v49  ;;  %4021 = vst [vmem:[#allocation10_spill] sm:$0xff] %v3903_v18  ;;  %v3905_v13 = vpop.f32.mrb[35].mxu1  ;;  %v3907_v0 = vpop.f32.mrb[43].mxu0 }
 0x270   :  { %4022 = vst [vmem:[#allocation11_spill] sm:$0xff] %v3905_v13  ;;  %4023 = vst [vmem:[#allocation12_spill] sm:$0xff] %v3907_v0 }
 0x272   :  { %v3909_v37 = vpop.f32.mrb[36].mxu1  ;;  %v3911_v1 = vpop.f32.mrb[44].mxu0 }
 0x273   :  { %4024 = vst [vmem:[#allocation13_spill] sm:$0xff] %v3909_v37  ;;  %4025 = vst [vmem:[#allocation14_spill] sm:$0xff] %v3911_v1  ;;  %v3913_v17 = vpop.f32.mrb[37].mxu1  ;;  %v3915_v19 = vpop.f32.mrb[45].mxu0 }
 0x274   :  { %4026 = vst [vmem:[#allocation15_spill] sm:$0xff] %v3913_v17  ;;  %4027 = vst [vmem:[#allocation16_spill] sm:$0xff] %v3915_v19 }
 0x276   :  { %v3917_v20 = vpop.f32.mrb[38].mxu1  ;;  %v3919_v6 = vpop.f32.mrb[46].mxu0 }
 0x277   :  { %4028 = vst [vmem:[#allocation17_spill] sm:$0xff] %v3917_v20  ;;  %4029 = vst [vmem:[#allocation18_spill] sm:$0xff] %v3919_v6  ;;  %v3921_v53 = vpop.f32.mrb[39].mxu1  ;;  %v3923_v22 = vpop.f32.mrb[47].mxu0 }
 0x278   :  { %4030 = vst [vmem:[#allocation19_spill] sm:$0xff] %v3921_v53  ;;  %4031 = vst [vmem:[#allocation20_spill] sm:$0xff] %v3923_v22 }
 0x27a   :  { %v3925_v27 = vpop.f32.mrb[40].mxu1  ;;  %v3927_v29 = vpop.f32.mrb[48].mxu0 }
 0x27b   :  { %4032 = vst [vmem:[#allocation21_spill] sm:$0xff] %v3925_v27  ;;  %4033 = vst [vmem:[#allocation22_spill] sm:$0xff] %v3927_v29  ;;  %v3929_v34 = vpop.f32.mrb[41].mxu1  ;;  %v3931_v36 = vpop.f32.mrb[49].mxu0 }
 0x27c   :  { %4034 = vst [vmem:[#allocation23_spill] sm:$0xff] %v3929_v34  ;;  %4035 = vst [vmem:[#allocation24_spill] sm:$0xff] %v3931_v36 }
 0x27e   :  { %v1703_v1 = vpop.f32.mrb[42].mxu1  ;;  %v1816_v17 = vpop.f32.mrb[50].mxu0 }
 0x27f   :  { %v2089_v19 = vmul.f32 %v1703_v1, %v3805_v23  ;;  %v2091_v20 = vmul.f32 %v1816_v17, %v3807_v26  ;;  %v1705_v37 = vpop.f32.mrb[43].mxu1  ;;  %v1818_v6 = vpop.f32.mrb[51].mxu0 }
 0x280   :  { %v2090_v53 = vmul.f32 %v1705_v37, %v3809_v51  ;;  %v2092_v22 = vmul.f32 %v1818_v6, %v3811_v54 }
 0x282   :  { %v1709_v0 = vpop.f32.mrb[44].mxu1  ;;  %v1822_v27 = vpop.f32.mrb[52].mxu0 }
 0x283   :  { %v2097_v29 = vmul.f32 %v1709_v0, %v3813_v4  ;;  %v2099_v34 = vmul.f32 %v1822_v27, %v3815_v7  ;;  %v1711_v13 = vpop.f32.mrb[45].mxu1  ;;  %v1824_v36 = vpop.f32.mrb[53].mxu0 }
 0x284   :  { %v2098_v18 = vmul.f32 %v1711_v13, %v3817_v11  ;;  %v2100_v23 = vmul.f32 %v1824_v36, %v3819_v62 }
 0x285   :  { %v2153_v1 = vadd.f32 %v2097_v29, %v2089_v19  ;;  %v2167_v26 = vadd.f32 %v2099_v34, %v2091_v20 }
 0x286   :  { %v2160_v17 = vadd.f32 %v2098_v18, %v2090_v53  ;;  %v2174_v49 = vadd.f32 %v2100_v23, %v2092_v22  ;;  %v1715_v50 = vpop.f32.mrb[46].mxu1  ;;  %v1828_v51 = vpop.f32.mrb[54].mxu0 }
 0x287   :  { %v2105_v54 = vmul.f32 %v1715_v50, %v3821_v8  ;;  %v2107_v37 = vmul.f32 %v1828_v51, %v3823_v16  ;;  %v1717_v6 = vpop.f32.mrb[47].mxu1  ;;  %v1830_v4 = vpop.f32.mrb[55].mxu0 }
 0x288   :  { %v2106_v7 = vmul.f32 %v1717_v6, %v3825_v9  ;;  %v2108_v0 = vmul.f32 %v1830_v4, %v3827_v35 }
 0x289   :  { %v2154_v27 = vadd.f32 %v2153_v1, %v2105_v54  ;;  %v2168_v11 = vadd.f32 %v2167_v26, %v2107_v37 }
 0x28a   :  { %v2161_v13 = vadd.f32 %v2160_v17, %v2106_v7  ;;  %v2175_v62 = vadd.f32 %v2174_v49, %v2108_v0  ;;  %v1721_v19 = vpop.f32.mrb[48].mxu1  ;;  %v1834_v20 = vpop.f32.mrb[56].mxu0 }
 0x28b   :  { %v2113_v18 = vmul.f32 %v1721_v19, %v3829_v39  ;;  %v2115_v53 = vmul.f32 %v1834_v20, %v3831_v38  ;;  %v1723_v22 = vpop.f32.mrb[49].mxu1  ;;  %v1836_v8 = vpop.f32.mrb[57].mxu0 }
 0x28c   :  { %v2114_v16 = vmul.f32 %v1723_v22, %v3833_v56  ;;  %v2116_v50 = vmul.f32 %v1836_v8, %v3835_v61 }
 0x28d   :  { %v2155_v29 = vadd.f32 %v2154_v27, %v2113_v18  ;;  %v2169_v9 = vadd.f32 %v2168_v11, %v2115_v53 }
 0x28e   :  { %v2162_v34 = vadd.f32 %v2161_v13, %v2114_v16  ;;  %v2176_v35 = vadd.f32 %v2175_v62, %v2116_v50  ;;  %v1727_v36 = vpop.f32.mrb[50].mxu1  ;;  %v1840_v23 = vpop.f32.mrb[58].mxu0 }
 0x28f   :  { %v2121_v49 = vmul.f32 %v1727_v36, %v3837_v43  ;;  %v2123_v1 = vmul.f32 %v1840_v23, %v3839_v44  ;;  %v1729_v26 = vpop.f32.mrb[51].mxu1  ;;  %v1842_v39 = vpop.f32.mrb[59].mxu0 }
 0x290   :  { %v2122_v38 = vmul.f32 %v1729_v26, %v3841_v46  ;;  %v2124_v17 = vmul.f32 %v1842_v39, %v3843_v48 }
 0x291   :  { %v2156_v51 = vadd.f32 %v2155_v29, %v2121_v49  ;;  %v2170_v56 = vadd.f32 %v2169_v9, %v2123_v1 }
 0x292   :  { %v2163_v54 = vadd.f32 %v2162_v34, %v2122_v38  ;;  %v2177_v61 = vadd.f32 %v2176_v35, %v2124_v17  ;;  %v1733_v37 = vpop.f32.mrb[52].mxu1  ;;  %v1846_v6 = vpop.f32.mrb[60].mxu0 }
 0x293   :  { %v2129_v4 = vmul.f32 %v1733_v37, %v3845_v47  ;;  %v2131_v7 = vmul.f32 %v1846_v6, %v3847_v40  ;;  %v1735_v0 = vpop.f32.mrb[53].mxu1  ;;  %v1848_v43 = vpop.f32.mrb[61].mxu0 }
 0x294   :  { %v2130_v44 = vmul.f32 %v1735_v0, %v3849_v60  ;;  %v2132_v27 = vmul.f32 %v1848_v43, %v3851_v32 }
 0x295   :  { %v2157_v11 = vadd.f32 %v2156_v51, %v2129_v4  ;;  %v2171_v46 = vadd.f32 %v2170_v56, %v2131_v7 }
 0x296   :  { %v2164_v13 = vadd.f32 %v2163_v54, %v2130_v44  ;;  %v2178_v48 = vadd.f32 %v2177_v61, %v2132_v27  ;;  %v1739_v62 = vpop.f32.mrb[54].mxu1  ;;  %v1852_v19 = vpop.f32.mrb[62].mxu0 }
 0x297   :  { %v2137_v20 = vmul.f32 %v1739_v62, %v3853_v33  ;;  %v2139_v18 = vmul.f32 %v1852_v19, %v3855_v41  ;;  %v1741_v53 = vpop.f32.mrb[55].mxu1  ;;  %v1854_v47 = vpop.f32.mrb[63].mxu0 }
 0x298   :  { %v2138_v40 = vmul.f32 %v1741_v53, %v3857_v57  ;;  %v2140_v22 = vmul.f32 %v1854_v47, %v3859_v42  ;;  %v4036_v53 = vld [vmem:[#allocation8_spill] sm:$0xff] }
 0x299   :  { %v2158_v8 = vadd.f32 %v2157_v11, %v2137_v20  ;;  %v2172_v60 = vadd.f32 %v2171_v46, %v2139_v18 }
 0x29a   :  { %v2165_v16 = vadd.f32 %v2164_v13, %v2138_v40  ;;  %v2179_v32 = vadd.f32 %v2178_v48, %v2140_v22  ;;  %v1745_v50 = vpop.f32.mrb[56].mxu1  ;;  %v1858_v29 = vpop.f32.mrb[64].mxu0 }
 0x29b   :  { %v2145_v9 = vmul.f32 %v1745_v50, %v3861_v59  ;;  %v2147_v34 = vmul.f32 %v1858_v29, %v3863_v24  ;;  %v1747_v35 = vpop.f32.mrb[57].mxu1  ;;  %v1860_v33 = vpop.f32.mrb[65].mxu0  ;;  %v4038_v50 = vld [vmem:[#allocation10_spill] sm:$0xff] }
 0x29c   :  { %v2146_v41 = vmul.f32 %v1747_v35, %v3865_v14  ;;  %v2148_v36 = vmul.f32 %v1860_v33, %v3867_v45  ;;  %v4040_v35 = vld [vmem:[#allocation12_spill] sm:$0xff] }
 0x29d   :  { %v2159_v23 = vadd.f32 %v2158_v8, %v2145_v9  ;;  %v2173_v57 = vadd.f32 %v2172_v60, %v2147_v34  ;;  %v4039_v34 = vld [vmem:[#allocation11_spill] sm:$0xff] }
 0x29e   :  { %v2166_v49 = vadd.f32 %v2165_v16, %v2146_v41  ;;  %v2180_v42 = vadd.f32 %v2179_v32, %v2148_v36  ;;  %v1929_v1 = vpop.f32.mrb[58].mxu1  ;;  %v2042_v26 = vpop.f32.mrb[66].mxu0  ;;  %v4037_v16 = vld [vmem:[#allocation9_spill] sm:$0xff] }
 0x29f   :  { %2213 = vst [vmem:[#allocation5] sm:$0xff] %v2159_v23  ;;  %2215 = vst [vmem:[#allocation5 + $0x10] sm:$0xff] %v2173_v57  ;;  %v2093_v39 = vmul.f32 %v1929_v1, %v3869_v21  ;;  %v2095_v59 = vmul.f32 %v2042_v26, %v3871_v15  ;;  %v1931_v38 = vpop.f32.mrb[59].mxu1  ;;  %v2044_v24 = vpop.f32.mrb[67].mxu0  ;;  %v4042_v26 = vld [vmem:[#allocation14_spill] sm:$0xff] }
 0x2a0   :  { %2214 = vst [vmem:[#allocation5 + $0x8] sm:$0xff] %v2166_v49  ;;  %2216 = vst [vmem:[#allocation5 + $0x18] sm:$0xff] %v2180_v42  ;;  %v2094_v14 = vmul.f32 %v1931_v38, %v3873_v63  ;;  %v2096_v45 = vmul.f32 %v2044_v24, %v3875_v12  ;;  %v4041_v42 = vld [vmem:[#allocation13_spill] sm:$0xff]  ;;  %v4043_v24 = vld [vmem:[#allocation15_spill] sm:$0xff] }
 0x2a2   :  { %v1935_v17 = vpop.f32.mrb[60].mxu1  ;;  %v2048_v51 = vpop.f32.mrb[68].mxu0 }
 0x2a3   :  { %v2101_v56 = vmul.f32 %v1935_v17, %v3877_v28  ;;  %v2103_v54 = vmul.f32 %v2048_v51, %v3879_v10  ;;  %v1937_v61 = vpop.f32.mrb[61].mxu1  ;;  %v2050_v37 = vpop.f32.mrb[69].mxu0 }
 0x2a4   :  { %v2102_v21 = vmul.f32 %v1937_v61, %v3881_v52  ;;  %v2104_v15 = vmul.f32 %v2050_v37, %v3883_v58 }
 0x2a5   :  { %v2181_v6 = vadd.f32 %v2101_v56, %v2093_v39  ;;  %v2195_v4 = vadd.f32 %v2103_v54, %v2095_v59 }
 0x2a6   :  { %v2188_v7 = vadd.f32 %v2102_v21, %v2094_v14  ;;  %v2202_v0 = vadd.f32 %v2104_v15, %v2096_v45  ;;  %v1941_v43 = vpop.f32.mrb[62].mxu1  ;;  %v2054_v63 = vpop.f32.mrb[70].mxu0  ;;  %v4044_v45 = vld [vmem:[#allocation16_spill] sm:$0xff]  ;;  %v4045_v15 = vld [vmem:[#allocation17_spill] sm:$0xff] }
 0x2a7   :  { %v2109_v12 = vmul.f32 %v1941_v43, %v3885_v2  ;;  %v2111_v44 = vmul.f32 %v2054_v63, %v3887_v3  ;;  %v1943_v27 = vpop.f32.mrb[63].mxu1  ;;  %v2056_v28 = vpop.f32.mrb[71].mxu0  ;;  %v4047_v63 = vld [vmem:[#allocation19_spill] sm:$0xff] }
 0x2a8   :  { %v2110_v10 = vmul.f32 %v1943_v27, %v3889_v31  ;;  %v2112_v11 = vmul.f32 %v2056_v28, %v3891_v5 }
 0x2a9   :  { %v2182_v46 = vadd.f32 %v2181_v6, %v2109_v12  ;;  %v2196_v52 = vadd.f32 %v2195_v4, %v2111_v44  ;;  %v4046_v4 = vld [vmem:[#allocation18_spill] sm:$0xff]  ;;  %v4048_v44 = vld [vmem:[#allocation20_spill] sm:$0xff] }
 0x2aa   :  { %v2189_v13 = vadd.f32 %v2188_v7, %v2110_v10  ;;  %v2203_v58 = vadd.f32 %v2202_v0, %v2112_v11  ;;  %v1947_v48 = vpop.f32.mrb[64].mxu1  ;;  %v2060_v62 = vpop.f32.mrb[72].mxu0 }
 0x2ab   :  { %v2117_v19 = vmul.f32 %v1947_v48, %v3893_v55  ;;  %v2119_v20 = vmul.f32 %v2060_v62, %v3895_v30  ;;  %v1949_v18 = vpop.f32.mrb[65].mxu1  ;;  %v2062_v2 = vpop.f32.mrb[73].mxu0  ;;  %v4050_v62 = vld [vmem:[#allocation22_spill] sm:$0xff] }
 0x2ac   :  { %v2118_v3 = vmul.f32 %v1949_v18, %v3897_v25  ;;  %v2120_v47 = vmul.f32 %v2062_v2, %v4036_v53  ;;  %v4051_v2 = vld [vmem:[#allocation23_spill] sm:$0xff]  ;;  %v4052_v53 = vld [vmem:[#allocation24_spill] sm:$0xff] }
 0x2ad   :  { %v2183_v40 = vadd.f32 %v2182_v46, %v2117_v19  ;;  %v2197_v31 = vadd.f32 %v2196_v52, %v2119_v20 }
 0x2ae   :  { %v2190_v22 = vadd.f32 %v2189_v13, %v2118_v3  ;;  %v2204_v5 = vadd.f32 %v2203_v58, %v2120_v47  ;;  %v1953_v8 = vpop.f32.mrb[66].mxu1  ;;  %v2066_v60 = vpop.f32.mrb[74].mxu0  ;;  %v4049_v58 = vld [vmem:[#allocation21_spill] sm:$0xff] }
 0x2af   :  { %v2125_v32 = vmul.f32 %v1953_v8, %v4037_v16  ;;  %v2127_v29 = vmul.f32 %v2066_v60, %v4038_v50  ;;  %v1955_v9 = vpop.f32.mrb[67].mxu1  ;;  %v2068_v55 = vpop.f32.mrb[75].mxu0 }
 0x2b0   :  { %v2126_v30 = vmul.f32 %v1955_v9, %v4039_v34  ;;  %v2128_v33 = vmul.f32 %v2068_v55, %v4040_v35 }
 0x2b1   :  { %v2184_v41 = vadd.f32 %v2183_v40, %v2125_v32  ;;  %v2198_v25 = vadd.f32 %v2197_v31, %v2127_v29 }
 0x2b2   :  { %v2191_v36 = vadd.f32 %v2190_v22, %v2126_v30  ;;  %v2205_v23 = vadd.f32 %v2204_v5, %v2128_v33  ;;  %v1959_v57 = vpop.f32.mrb[68].mxu1  ;;  %v2072_v49 = vpop.f32.mrb[76].mxu0 }
 0x2b3   :  { %v2133_v1 = vmul.f32 %v1959_v57, %v4041_v42  ;;  %v2135_v39 = vmul.f32 %v2072_v49, %v4042_v26  ;;  %v1961_v59 = vpop.f32.mrb[69].mxu1  ;;  %v2074_v38 = vpop.f32.mrb[77].mxu0 }
 0x2b4   :  { %v2134_v14 = vmul.f32 %v1961_v59, %v4043_v24  ;;  %v2136_v17 = vmul.f32 %v2074_v38, %v4044_v45 }
 0x2b5   :  { %v2185_v51 = vadd.f32 %v2184_v41, %v2133_v1  ;;  %v2199_v56 = vadd.f32 %v2198_v25, %v2135_v39 }
 0x2b6   :  { %v2192_v54 = vadd.f32 %v2191_v36, %v2134_v14  ;;  %v2206_v61 = vadd.f32 %v2205_v23, %v2136_v17  ;;  %v1965_v37 = vpop.f32.mrb[70].mxu1  ;;  %v2078_v21 = vpop.f32.mrb[78].mxu0 }
 0x2b7   :  { %v2141_v6 = vmul.f32 %v1965_v37, %v4045_v15  ;;  %v2143_v7 = vmul.f32 %v2078_v21, %v4046_v4  ;;  %v1967_v0 = vpop.f32.mrb[71].mxu1  ;;  %v2080_v43 = vpop.f32.mrb[79].mxu0 }
 0x2b8   :  { %v2142_v12 = vmul.f32 %v1967_v0, %v4047_v63  ;;  %v2144_v27 = vmul.f32 %v2080_v43, %v4048_v44 }
 0x2b9   :  { %v2186_v28 = vadd.f32 %v2185_v51, %v2141_v6  ;;  %v2200_v10 = vadd.f32 %v2199_v56, %v2143_v7 }
 0x2ba   :  { %v2193_v11 = vadd.f32 %v2192_v54, %v2142_v12  ;;  %v2207_v46 = vadd.f32 %v2206_v61, %v2144_v27  ;;  %v1971_v52 = vpop.f32.mrb[72].mxu1  ;;  %v2084_v13 = vpop.f32.mrb[80].mxu0 }
 0x2bb   :  { %v2149_v48 = vmul.f32 %v1971_v52, %v4049_v58  ;;  %v2151_v19 = vmul.f32 %v2084_v13, %v4050_v62  ;;  %v1973_v20 = vpop.f32.mrb[73].mxu1  ;;  %v2086_v18 = vpop.f32.mrb[81].mxu0 }
 0x2bc   :  { %v2150_v3 = vmul.f32 %v1973_v20, %v4051_v2  ;;  %v2152_v47 = vmul.f32 %v2086_v18, %v4052_v53 }
 0x2bd   :  { %v2187_v40 = vadd.f32 %v2186_v28, %v2149_v48  ;;  %v2201_v31 = vadd.f32 %v2200_v10, %v2151_v19 }
 0x2be   :  { %v2194_v22 = vadd.f32 %v2193_v11, %v2150_v3  ;;  %v2208_v5 = vadd.f32 %v2207_v46, %v2152_v47 }
 0x2bf   :  { %2217 = vst [vmem:[#allocation5 + $0x20] sm:$0xff] %v2187_v40  ;;  %2219 = vst [vmem:[#allocation5 + $0x30] sm:$0xff] %v2201_v31 }
 0x2c0   :  { %2218 = vst [vmem:[#allocation5 + $0x28] sm:$0xff] %v2194_v22  ;;  %2220 = vst [vmem:[#allocation5 + $0x38] sm:$0xff] %v2208_v5 }
 0x2c1   :  { %2803 = shalt.err (!%p2800_p12)
}
 0x2c2   :  { %s2804_s26 = scalar_lea.hbm %s4018_s9, 1024 }
 0x2c3   :  { %p2805_p13 = scmp.ne.s32.totalorder %s4018_s9, %s2804_s26  ;;  %p2808_p0 = scmp.lt.u32.totalorder %s2804_s26, %s4018_s9 }
 0x2c5   :  { %p2810_p1 = pnand %p2808_p0, %p2805_p13 }
 0x2c7   :  { %2813 = shalt.err (!%p2810_p1)
}
 0x2c8   :  { %2258 = dma.vmem_to_hbm [thread:$0]  %s2256_s23, 1024, %s4018_s9, [#allocation4]  }
 0x2c9   :  { %2816 = dma.done.wait [#allocation4], 1024  }
 0x2ca   :  { %2817 = vsyncadd [#allocation4], 4294966272 }
 0x2cb   :  { %2262 = vsyncpa [#allocation3], 1 }
 0x2cc   :  { %2263 = vsyncpa [#allocation4], 1 }

</bundles_post_ra>
